<compile_context>
chip_gen: v6e
topology: v6e:2x2x1
jax: 0.10.0
libtpu: 0.0.40
codegen_flags: <defaults>
</compile_context>

<pallas_src>
import functools
import math

import jax
import jax.numpy as jnp
from jax.experimental import pallas as pl
from jax.experimental.pallas import tpu as pltpu


def _round_up(a: int, b: int) -> int:
    return ((a + b - 1) // b) * b


def _vmem_capacity_bytes() -> int:
    """Physical VMEM per TensorCore (generation-aware, with safe fallbacks)."""
    try:
        return int(pltpu.get_tpu_info().vmem_capacity_bytes)
    except Exception:
        pass
    try:
        kind = jax.devices()[0].device_kind.lower()
        if "v7" in kind:
            return 64 * 1024 * 1024
    except Exception:
        pass
    return 128 * 1024 * 1024


def _pick_tile_out(out_pad: int, cap: int) -> int:
    """Largest multiple-of-128 divisor of out_pad that is <= cap (min 128)."""
    m = out_pad // 128
    best = 128
    for d in range(1, m + 1):
        if m % d == 0 and 128 * d <= cap:
            best = 128 * d
    return best


def _footprint_bytes(tile_n, tile_out, in_pad, k_total, T, coeff, spline_order):
    """Rough per-step VMEM footprint (double-buffered blocks + scratch + temps)."""
    b = 2 * tile_n * in_pad * 4                      # x block
    b += 2 * T * in_pad * 4                          # grid^T
    b += 4 * spline_order * (T - 2) * in_pad * 4     # rl + rr reciprocals
    b += 2 * k_total * tile_out * 2                  # fused bf16 weight block
    b += 2 * tile_n * tile_out * 4                   # output block
    b += (coeff + 1) * tile_n * in_pad * 2           # bf16 feats scratch
    b += 3 * (T - 1) * tile_n * in_pad * 4           # f32 basis recursion temps
    return b


def _kan_kernel(x_ref, gt_ref, rl_ref, rr_ref, w_ref, out_ref, feats_ref, *,
                spline_order: int, in_pad: int, coeff: int):
    """One (batch-tile, out-tile) block of the KANLinear forward.

    Grid: (batch tiles [outer, parallel], out tiles [inner, arbitrary]).

    x_ref:     (tile_n, in_pad)              f32  (same block across all out tiles)
    gt_ref:    (T, in_pad)                   f32  grid transposed (lane = in)
    rl_ref:    (K, T-2, in_pad)              f32  1/(g[t+k]   - g[t])
    rr_ref:    (K, T-2, in_pad)              f32  1/(g[t+k+1] - g[t+1])
    w_ref:     ((coeff+1)*in_pad, tile_out)  bf16 fused [base ; spline] weight
    out_ref:   (tile_n, tile_out)            f32
    feats_ref: (coeff+1, tile_n, in_pad)     bf16 VMEM scratch = [SiLU(x); bases]
    """
    # SiLU + Cox-de Boor recursion is the dominant non-MXU cost: compute once per
    # batch tile (out tiles are the inner grid axis) and cache in VMEM scratch.
    @pl.when(pl.program_id(1) == 0)
    def _compute_feats():
        x = x_ref[...]                                        # (tile_n, in_pad)
        feats_ref[0] = (x * jax.nn.sigmoid(x)).astype(feats_ref.dtype)

        gt = gt_ref[...]                                      # (T, in_pad)
        T = gt.shape[0]
        xe = x[None, :, :]                                    # (1, tile_n, in_pad)
        gtb = gt[:, None, :]                                  # (T, 1, in_pad)

        # Coefficient-major bases: (basis_idx, tile_n, in_pad). All slices below
        # are leading-dim slices -> no (8,128) tile-crossing relayouts.
        bases = jnp.logical_and(xe >= gtb[:-1], xe < gtb[1:]).astype(x.dtype)
        for k in range(1, spline_order + 1):
            W = T - k - 1
            rl = rl_ref[k - 1, :W, :][:, None, :]             # (W, 1, in_pad)
            rr = rr_ref[k - 1, :W, :][:, None, :]
            left = (xe - gtb[:W]) * rl * bases[:-1]
            right = (gtb[k + 1:] - xe) * rr * bases[1:]
            bases = left + right
        # bases: (coeff, tile_n, in_pad); cast to bf16 once, right here.
        feats_ref[1:] = bases.astype(feats_ref.dtype)

    # Per-coefficient MXU dots against static ref views (K = in_pad >= 128 each),
    # accumulated in f32. No concat, no flatten, no extra VMEM copies.
    acc = jnp.dot(feats_ref[0], w_ref[0:in_pad, :],
                  preferred_element_type=jnp.float32)
    for c in range(1, coeff + 1):
        acc = acc + jnp.dot(feats_ref[c],
                            w_ref[c * in_pad:(c + 1) * in_pad, :],
                            preferred_element_type=jnp.float32)
    out_ref[...] = acc.astype(out_ref.dtype)


def kan_linear_forward(x, grid, base_weight, spline_weight, spline_scaler,
                       *, grid_size: int, spline_order: int,
                       tile_n: int | None = None, tile_out: int | None = None,
                       matmul_dtype=jnp.bfloat16):
    """KANLinear.forward. x: (..., in_features) -> (..., out_features)."""
    out_features, in_features = base_weight.shape
    coeff = grid_size + spline_order
    T = grid.shape[1]                                  # G + 2K + 1

    original_shape = x.shape
    x2 = x.reshape(-1, in_features).astype(jnp.float32)
    n = x2.shape[0]

    # ---- lane-dense / MXU-friendly padding ----
    in_pad = _round_up(in_features, 128)
    out_pad = _round_up(out_features, 128)             # <=127 wasted columns
    k_total = (coeff + 1) * in_pad

    # ---- generation-aware VMEM budget and tile selection ----
    cap = _vmem_capacity_bytes()
    budget = max(int(0.6 * cap), 32 * 1024 * 1024)      # headroom for compiler scratch
    if tile_out is None:
        tile_out = _pick_tile_out(out_pad, min(out_pad, 512))
    if tile_n is None:
        tile_n = max(8, min(256, _round_up(n, 8)))
    while _footprint_bytes(tile_n, tile_out, in_pad, k_total, T, coeff,
                           spline_order) > budget:
        if tile_out > 128:
            tile_out = _pick_tile_out(out_pad, tile_out - 128)
        elif tile_n > 64:
            tile_n = max(64, tile_n // 2)
        else:
            break
    # TODO(synk): for very large in_features where the weight block alone exceeds
    # the VMEM budget, add a K-reduction grid axis (chunking `coeff`) with an f32
    # VMEM accumulator + pl.when init/finalize.

    n_pad = _round_up(n, tile_n)
    n_batch_tiles = n_pad // tile_n
    n_out_tiles = out_pad // tile_out

    x_p = jnp.zeros((n_pad, in_pad), jnp.float32).at[:n, :in_features].set(x2)

    # Pad grid along in_features by repeating row 0 (keeps knots strictly
    # increasing so padded-lane bases stay finite; their weights are zero).
    grid = grid.astype(jnp.float32)
    if in_pad > in_features:
        pad_rows = jnp.broadcast_to(grid[:1], (in_pad - in_features, T))
        grid_p = jnp.concatenate([grid, pad_rows], axis=0)
    else:
        grid_p = grid
    gt = jnp.asarray(grid_p.T)                          # (T, in_pad), lane = in

    # ---- precompute Cox-de Boor denominator reciprocals once in the glue ----
    w_max = T - 2
    rl = jnp.zeros((spline_order, w_max, in_pad), jnp.float32)
    rr = jnp.zeros((spline_order, w_max, in_pad), jnp.float32)
    for k in range(1, spline_order + 1):
        width = T - k - 1
        dl = gt[k:T - 1, :] - gt[0:width, :]            # g[t+k]   - g[t]
        dr = gt[k + 1:T, :] - gt[1:T - k, :]            # g[t+k+1] - g[t+1]
        rl = rl.at[k - 1, :width, :].set(1.0 / dl)
        rr = rr.at[k - 1, :width, :].set(1.0 / dr)

    # ---- fused [base ; spline] weight: padded, cast, and pre-blocked in glue ----
    scaled_spline = spline_weight * spline_scaler[..., None]        # (out, in, coeff)
    w_spline = jnp.transpose(scaled_spline, (2, 1, 0))              # (coeff, in, out)
    w_spline_p = jnp.zeros((coeff, in_pad, out_pad), jnp.float32)
    w_spline_p = w_spline_p.at[:, :in_features, :out_features].set(w_spline)
    w_base_p = jnp.zeros((in_pad, out_pad), jnp.float32)
    w_base_p = w_base_p.at[:in_features, :out_features].set(base_weight.T)
    w_flat = jnp.concatenate(
        [w_base_p, w_spline_p.reshape(coeff * in_pad, out_pad)], axis=0
    ).astype(matmul_dtype)                                          # (k_total, out_pad)
    # Pre-block so each out-tile weight fetch is one contiguous slab.
    w_blocked = w_flat.reshape(k_total, n_out_tiles, tile_out).transpose(1, 0, 2)

    kernel = functools.partial(_kan_kernel, spline_order=spline_order,
                               in_pad=in_pad, coeff=coeff)

    out = pl.pallas_call(
        kernel,
        out_shape=jax.ShapeDtypeStruct((n_pad, out_pad), jnp.float32),
        grid_spec=pltpu.PrefetchScalarGridSpec(
            num_scalar_prefetch=0,
            # batch tiles outermost ("parallel"), out tiles innermost
            # ("arbitrary") so the cached feats scratch is reused across out
            # tiles of the same batch tile.
            grid=(n_batch_tiles, n_out_tiles),
            in_specs=[
                pl.BlockSpec((tile_n, in_pad), lambda i, j: (i, 0)),
                pl.BlockSpec((T, in_pad), lambda i, j: (0, 0)),
                pl.BlockSpec((spline_order, w_max, in_pad), lambda i, j: (0, 0, 0)),
                pl.BlockSpec((spline_order, w_max, in_pad), lambda i, j: (0, 0, 0)),
                pl.BlockSpec((None, k_total, tile_out), lambda i, j: (j, 0, 0)),
            ],
            out_specs=pl.BlockSpec((tile_n, tile_out), lambda i, j: (i, j)),
            scratch_shapes=[pltpu.VMEM((coeff + 1, tile_n, in_pad), matmul_dtype)],
        ),
        compiler_params=pltpu.CompilerParams(
            dimension_semantics=("parallel", "arbitrary"),
            vmem_limit_bytes=int(budget),
        ),
    )(x_p, gt, rl, rr, w_blocked)

    out = out[:n, :out_features]
    return out.reshape(*original_shape[:-1], out_features)


# ----------------------- pure-JAX reference (for checking) -----------------------
def _b_splines_ref(x, grid, spline_order):
    xe = x[:, :, None]
    g = grid[None, :, :]
    bases = jnp.logical_and(xe >= g[:, :, :-1], xe < g[:, :, 1:]).astype(x.dtype)
    for k in range(1, spline_order + 1):
        bases = ((xe - g[:, :, : -(k + 1)]) /
                 (g[:, :, k:-1] - g[:, :, : -(k + 1)])) * bases[:, :, :-1] + \
                ((g[:, :, k + 1:] - xe) /
                 (g[:, :, k + 1:] - g[:, :, 1:-k])) * bases[:, :, 1:]
    return bases


def _kan_ref(x, grid, base_weight, spline_weight, spline_scaler, spline_order):
    in_features = base_weight.shape[1]
    out_features = base_weight.shape[0]
    orig = x.shape
    x2 = x.reshape(-1, in_features)
    base_out = jax.nn.silu(x2) @ base_weight.T
    bases = _b_splines_ref(x2, grid, spline_order).reshape(x2.shape[0], -1)
    sw = (spline_weight * spline_scaler[..., None]).reshape(out_features, -1)
    spline_out = bases @ sw.T
    return (base_out + spline_out).reshape(*orig[:-1], out_features)


if __name__ == "__main__":
    # Module config (small, consistent with KANLinear defaults)
    in_features = 32
    out_features = 16
    grid_size = 5
    spline_order = 3
    grid_range = (-1.0, 1.0)
    coeff = grid_size + spline_order

    key = jax.random.PRNGKey(0)
    k_x, k_bw, k_sw, k_ss = jax.random.split(key, 4)

    h = (grid_range[1] - grid_range[0]) / grid_size
    grid_1d = jnp.arange(-spline_order, grid_size + spline_order + 1,
                         dtype=jnp.float32) * h + grid_range[0]
    grid = jnp.broadcast_to(grid_1d, (in_features, grid_1d.shape[0]))  # (in, G+2K+1)

    bound_base = math.sqrt(6.0 / in_features)
    base_weight = jax.random.uniform(k_bw, (out_features, in_features),
                                     minval=-bound_base, maxval=bound_base,
                                     dtype=jnp.float32)
    # TODO(synk): torch init derives spline_weight via lstsq (curve2coeff); here we
    # use a deterministic random init of the same shape instead.
    spline_weight = jax.random.uniform(k_sw, (out_features, in_features, coeff),
                                       minval=-0.1, maxval=0.1, dtype=jnp.float32)
    spline_scaler = jax.random.uniform(k_ss, (out_features, in_features),
                                       minval=-bound_base, maxval=bound_base,
                                       dtype=jnp.float32)

    # Example input: (batch=2, seq=8, in_features=32), values inside grid_range.
    x = jax.random.uniform(k_x, (2, 8, in_features),
                           minval=-0.95, maxval=0.95, dtype=jnp.float32)

    out = kan_linear_forward(x, grid, base_weight, spline_weight, spline_scaler,
                             grid_size=grid_size, spline_order=spline_order)
    out = jax.block_until_ready(out)

    ref = _kan_ref(x, grid, base_weight, spline_weight, spline_scaler, spline_order)
    assert out.shape == (2, 8, out_features)
    # bf16 MXU operands with f32 accumulation -> looser tolerance than pure f32.
    assert jnp.allclose(out, ref, atol=3e-2, rtol=3e-2), \
        f"max err {jnp.max(jnp.abs(out - ref))}"

    print("KERNEL_OK")
</pallas_src>

<mosaic_0001>
module attributes {stable_mosaic.version = 11 : i64} {
  func.func @_kan_kernel(%arg0: i32, %arg1: i32, %arg2: memref<16x128xf32, #tpu.memory_space<vmem>>, %arg3: memref<12x128xf32, #tpu.memory_space<vmem>>, %arg4: memref<3x10x128xf32, #tpu.memory_space<vmem>>, %arg5: memref<3x10x128xf32, #tpu.memory_space<vmem>>, %arg6: memref<1x1152x128xbf16, #tpu.memory_space<vmem>>, %arg7: memref<16x128xf32, #tpu.memory_space<vmem>>, %arg8: memref<9x16x128xbf16, #tpu.memory_space<vmem>>) attributes {dimension_semantics = [#tpu.dimension_semantics<parallel>, #tpu.dimension_semantics<arbitrary>], iteration_bounds = array<i64: 1, 1>, scalar_prefetch = 0 : i64, scratch_operands = 1 : i64, tpu.core_type = #tpu.core_type<tc>, window_params = [{transform_indices = @transform_0, window_bounds = array<i64: 16, 128>}, {pipeline_mode = #tpu.pipeline_mode<synchronous>, transform_indices = @transform_1, window_bounds = array<i64: 12, 128>}, {pipeline_mode = #tpu.pipeline_mode<synchronous>, transform_indices = @transform_2, window_bounds = array<i64: 3, 10, 128>}, {pipeline_mode = #tpu.pipeline_mode<synchronous>, transform_indices = @transform_3, window_bounds = array<i64: 3, 10, 128>}, {transform_indices = @transform_4, window_bounds = array<i64: 1, 1152, 128>}, {transform_indices = @transform_5, window_bounds = array<i64: 16, 128>}]} {
    %c0_i32 = arith.constant 0 : i32
    %0 = arith.cmpi eq, %arg1, %c0_i32 : i32
    %1 = arith.extui %0 : i1 to i32
    %c0_i32_0 = arith.constant 0 : i32
    %2 = arith.cmpi ne, %1, %c0_i32_0 : i32
    scf.if %2 {
      %c0_48 = arith.constant 0 : index
      %c0_49 = arith.constant 0 : index
      %57 = vector.load %arg2[%c0_48, %c0_49] : memref<16x128xf32, #tpu.memory_space<vmem>>, vector<16x128xf32>
      %58 = arith.negf %57 : vector<16x128xf32>
      %59 = math.exp %58 : vector<16x128xf32>
      %cst_50 = arith.constant 1.000000e+00 : f32
      %60 = vector.broadcast %cst_50 : f32 to vector<16x128xf32>
      %61 = arith.addf %60, %59 : vector<16x128xf32>
      %62 = arith.divf %60, %61 : vector<16x128xf32>
      %63 = arith.mulf %57, %62 : vector<16x128xf32>
      %64 = arith.truncf %63 : vector<16x128xf32> to vector<16x128xbf16>
      %c0_51 = arith.constant 0 : index
      %c0_52 = arith.constant 0 : index
      %c0_53 = arith.constant 0 : index
      %65 = vector.load %arg8[%c0_51, %c0_52, %c0_53] : memref<9x16x128xbf16, #tpu.memory_space<vmem>>, vector<1x16x128xbf16>
      %66 = vector.shape_cast %65 : vector<1x16x128xbf16> to vector<16x128xbf16>
      %67 = vector.shape_cast %64 : vector<16x128xbf16> to vector<1x16x128xbf16>
      tpu.vector_store %arg8[%c0_51, %c0_52, %c0_53], %67 {strides = array<i32>} : memref<9x16x128xbf16, #tpu.memory_space<vmem>>, vector<1x16x128xbf16>,
      %c0_54 = arith.constant 0 : index
      %c0_55 = arith.constant 0 : index
      %68 = vector.load %arg3[%c0_54, %c0_55] : memref<12x128xf32, #tpu.memory_space<vmem>>, vector<12x128xf32>
      %69 = vector.shape_cast %57 : vector<16x128xf32> to vector<1x16x128xf32>
      %70 = vector.shape_cast %68 : vector<12x128xf32> to vector<12x1x128xf32>
      %71 = vector.extract_strided_slice %70 {offsets = [0, 0, 0], sizes = [11, 1, 128], strides = [1, 1, 1]} : vector<12x1x128xf32> to vector<11x1x128xf32>
      %72 = vector.broadcast %69 : vector<1x16x128xf32> to vector<11x16x128xf32>
      %73 = vector.broadcast %71 : vector<11x1x128xf32> to vector<11x16x128xf32>
      %74 = arith.cmpf oge, %72, %73 : vector<11x16x128xf32>
      %75 = vector.extract_strided_slice %70 {offsets = [1, 0, 0], sizes = [11, 1, 128], strides = [1, 1, 1]} : vector<12x1x128xf32> to vector<11x1x128xf32>
      %76 = vector.broadcast %69 : vector<1x16x128xf32> to vector<11x16x128xf32>
      %77 = vector.broadcast %75 : vector<11x1x128xf32> to vector<11x16x128xf32>
      %78 = arith.cmpf olt, %76, %77 : vector<11x16x128xf32>
      %79 = arith.andi %74, %78 : vector<11x16x128xi1>
      %80 = arith.extui %79 : vector<11x16x128xi1> to vector<11x16x128xi32>
      %81 = arith.sitofp %80 : vector<11x16x128xi32> to vector<11x16x128xf32>
      %c0_56 = arith.constant 0 : index
      %c0_57 = arith.constant 0 : index
      %c0_58 = arith.constant 0 : index
      %82 = vector.load %arg4[%c0_56, %c0_57, %c0_58] : memref<3x10x128xf32, #tpu.memory_space<vmem>>, vector<1x10x128xf32>
      %83 = vector.shape_cast %82 : vector<1x10x128xf32> to vector<10x128xf32>
      %84 = vector.shape_cast %83 : vector<10x128xf32> to vector<10x1x128xf32>
      %c0_59 = arith.constant 0 : index
      %c0_60 = arith.constant 0 : index
      %c0_61 = arith.constant 0 : index
      %85 = vector.load %arg5[%c0_59, %c0_60, %c0_61] : memref<3x10x128xf32, #tpu.memory_space<vmem>>, vector<1x10x128xf32>
      %86 = vector.shape_cast %85 : vector<1x10x128xf32> to vector<10x128xf32>
      %87 = vector.shape_cast %86 : vector<10x128xf32> to vector<10x1x128xf32>
      %88 = vector.extract_strided_slice %70 {offsets = [0, 0, 0], sizes = [10, 1, 128], strides = [1, 1, 1]} : vector<12x1x128xf32> to vector<10x1x128xf32>
      %89 = vector.broadcast %69 : vector<1x16x128xf32> to vector<10x16x128xf32>
      %90 = vector.broadcast %88 : vector<10x1x128xf32> to vector<10x16x128xf32>
      %91 = arith.subf %89, %90 : vector<10x16x128xf32>
      %92 = vector.broadcast %84 : vector<10x1x128xf32> to vector<10x16x128xf32>
      %93 = arith.mulf %91, %92 : vector<10x16x128xf32>
      %94 = vector.extract_strided_slice %81 {offsets = [0, 0, 0], sizes = [10, 16, 128], strides = [1, 1, 1]} : vector<11x16x128xf32> to vector<10x16x128xf32>
      %95 = arith.mulf %93, %94 : vector<10x16x128xf32>
      %96 = vector.extract_strided_slice %70 {offsets = [2, 0, 0], sizes = [10, 1, 128], strides = [1, 1, 1]} : vector<12x1x128xf32> to vector<10x1x128xf32>
      %97 = vector.broadcast %96 : vector<10x1x128xf32> to vector<10x16x128xf32>
      %98 = vector.broadcast %69 : vector<1x16x128xf32> to vector<10x16x128xf32>
      %99 = arith.subf %97, %98 : vector<10x16x128xf32>
      %100 = vector.broadcast %87 : vector<10x1x128xf32> to vector<10x16x128xf32>
      %101 = arith.mulf %99, %100 : vector<10x16x128xf32>
      %102 = vector.extract_strided_slice %81 {offsets = [1, 0, 0], sizes = [10, 16, 128], strides = [1, 1, 1]} : vector<11x16x128xf32> to vector<10x16x128xf32>
      %103 = arith.mulf %101, %102 : vector<10x16x128xf32>
      %104 = arith.addf %95, %103 : vector<10x16x128xf32>
      %c1_62 = arith.constant 1 : index
      %c0_63 = arith.constant 0 : index
      %c0_64 = arith.constant 0 : index
      %105 = vector.load %arg4[%c1_62, %c0_63, %c0_64] : memref<3x10x128xf32, #tpu.memory_space<vmem>>, vector<1x9x128xf32>
      %106 = vector.shape_cast %105 : vector<1x9x128xf32> to vector<9x128xf32>
      %107 = vector.shape_cast %106 : vector<9x128xf32> to vector<9x1x128xf32>
      %c1_65 = arith.constant 1 : index
      %c0_66 = arith.constant 0 : index
      %c0_67 = arith.constant 0 : index
      %108 = vector.load %arg5[%c1_65, %c0_66, %c0_67] : memref<3x10x128xf32, #tpu.memory_space<vmem>>, vector<1x9x128xf32>
      %109 = vector.shape_cast %108 : vector<1x9x128xf32> to vector<9x128xf32>
      %110 = vector.shape_cast %109 : vector<9x128xf32> to vector<9x1x128xf32>
      %111 = vector.extract_strided_slice %70 {offsets = [0, 0, 0], sizes = [9, 1, 128], strides = [1, 1, 1]} : vector<12x1x128xf32> to vector<9x1x128xf32>
      %112 = vector.broadcast %69 : vector<1x16x128xf32> to vector<9x16x128xf32>
      %113 = vector.broadcast %111 : vector<9x1x128xf32> to vector<9x16x128xf32>
      %114 = arith.subf %112, %113 : vector<9x16x128xf32>
      %115 = vector.broadcast %107 : vector<9x1x128xf32> to vector<9x16x128xf32>
      %116 = arith.mulf %114, %115 : vector<9x16x128xf32>
      %117 = vector.extract_strided_slice %104 {offsets = [0, 0, 0], sizes = [9, 16, 128], strides = [1, 1, 1]} : vector<10x16x128xf32> to vector<9x16x128xf32>
      %118 = arith.mulf %116, %117 : vector<9x16x128xf32>
      %119 = vector.extract_strided_slice %70 {offsets = [3, 0, 0], sizes = [9, 1, 128], strides = [1, 1, 1]} : vector<12x1x128xf32> to vector<9x1x128xf32>
      %120 = vector.broadcast %119 : vector<9x1x128xf32> to vector<9x16x128xf32>
      %121 = vector.broadcast %69 : vector<1x16x128xf32> to vector<9x16x128xf32>
      %122 = arith.subf %120, %121 : vector<9x16x128xf32>
      %123 = vector.broadcast %110 : vector<9x1x128xf32> to vector<9x16x128xf32>
      %124 = arith.mulf %122, %123 : vector<9x16x128xf32>
      %125 = vector.extract_strided_slice %104 {offsets = [1, 0, 0], sizes = [9, 16, 128], strides = [1, 1, 1]} : vector<10x16x128xf32> to vector<9x16x128xf32>
      %126 = arith.mulf %124, %125 : vector<9x16x128xf32>
      %127 = arith.addf %118, %126 : vector<9x16x128xf32>
      %c2_68 = arith.constant 2 : index
      %c0_69 = arith.constant 0 : index
      %c0_70 = arith.constant 0 : index
      %128 = vector.load %arg4[%c2_68, %c0_69, %c0_70] : memref<3x10x128xf32, #tpu.memory_space<vmem>>, vector<1x8x128xf32>
      %129 = vector.shape_cast %128 : vector<1x8x128xf32> to vector<8x128xf32>
      %130 = vector.shape_cast %129 : vector<8x128xf32> to vector<8x1x128xf32>
      %c2_71 = arith.constant 2 : index
      %c0_72 = arith.constant 0 : index
      %c0_73 = arith.constant 0 : index
      %131 = vector.load %arg5[%c2_71, %c0_72, %c0_73] : memref<3x10x128xf32, #tpu.memory_space<vmem>>, vector<1x8x128xf32>
      %132 = vector.shape_cast %131 : vector<1x8x128xf32> to vector<8x128xf32>
      %133 = vector.shape_cast %132 : vector<8x128xf32> to vector<8x1x128xf32>
      %134 = vector.extract_strided_slice %70 {offsets = [0, 0, 0], sizes = [8, 1, 128], strides = [1, 1, 1]} : vector<12x1x128xf32> to vector<8x1x128xf32>
      %135 = vector.broadcast %69 : vector<1x16x128xf32> to vector<8x16x128xf32>
      %136 = vector.broadcast %134 : vector<8x1x128xf32> to vector<8x16x128xf32>
      %137 = arith.subf %135, %136 : vector<8x16x128xf32>
      %138 = vector.broadcast %130 : vector<8x1x128xf32> to vector<8x16x128xf32>
      %139 = arith.mulf %137, %138 : vector<8x16x128xf32>
      %140 = vector.extract_strided_slice %127 {offsets = [0, 0, 0], sizes = [8, 16, 128], strides = [1, 1, 1]} : vector<9x16x128xf32> to vector<8x16x128xf32>
      %141 = arith.mulf %139, %140 : vector<8x16x128xf32>
      %142 = vector.extract_strided_slice %70 {offsets = [4, 0, 0], sizes = [8, 1, 128], strides = [1, 1, 1]} : vector<12x1x128xf32> to vector<8x1x128xf32>
      %143 = vector.broadcast %142 : vector<8x1x128xf32> to vector<8x16x128xf32>
      %144 = vector.broadcast %69 : vector<1x16x128xf32> to vector<8x16x128xf32>
      %145 = arith.subf %143, %144 : vector<8x16x128xf32>
      %146 = vector.broadcast %133 : vector<8x1x128xf32> to vector<8x16x128xf32>
      %147 = arith.mulf %145, %146 : vector<8x16x128xf32>
      %148 = vector.extract_strided_slice %127 {offsets = [1, 0, 0], sizes = [8, 16, 128], strides = [1, 1, 1]} : vector<9x16x128xf32> to vector<8x16x128xf32>
      %149 = arith.mulf %147, %148 : vector<8x16x128xf32>
      %150 = arith.addf %141, %149 : vector<8x16x128xf32>
      %151 = arith.truncf %150 : vector<8x16x128xf32> to vector<8x16x128xbf16>
      %c1_74 = arith.constant 1 : index
      %c0_75 = arith.constant 0 : index
      %c0_76 = arith.constant 0 : index
      %152 = vector.load %arg8[%c1_74, %c0_75, %c0_76] : memref<9x16x128xbf16, #tpu.memory_space<vmem>>, vector<8x16x128xbf16>
      tpu.vector_store %arg8[%c1_74, %c0_75, %c0_76], %151 {strides = array<i32>} : memref<9x16x128xbf16, #tpu.memory_space<vmem>>, vector<8x16x128xbf16>,
    } else {
    }
    %c0 = arith.constant 0 : index
    %c0_1 = arith.constant 0 : index
    %c0_2 = arith.constant 0 : index
    %3 = vector.load %arg8[%c0, %c0_1, %c0_2] : memref<9x16x128xbf16, #tpu.memory_space<vmem>>, vector<1x16x128xbf16>
    %4 = vector.shape_cast %3 : vector<1x16x128xbf16> to vector<16x128xbf16>
    %c0_3 = arith.constant 0 : index
    %c0_4 = arith.constant 0 : index
    %c0_5 = arith.constant 0 : index
    %5 = vector.load %arg6[%c0_3, %c0_4, %c0_5] : memref<1x1152x128xbf16, #tpu.memory_space<vmem>>, vector<1x128x128xbf16>
    %6 = vector.shape_cast %5 : vector<1x128x128xbf16> to vector<128x128xbf16>
    %cst = arith.constant dense<0.000000e+00> : vector<16x128xf32>
    %7 = tpu.matmul %4, %6, %cst {dimension_numbers = #tpu.dot_dimension_numbers<[1], [0], [0], [1], [0, 0, 1, 1], [], []>} : vector<16x128xbf16>, vector<128x128xbf16>, vector<16x128xf32> -> vector<16x128xf32>
    %c1 = arith.constant 1 : index
    %c0_6 = arith.constant 0 : index
    %c0_7 = arith.constant 0 : index
    %8 = vector.load %arg8[%c1, %c0_6, %c0_7] : memref<9x16x128xbf16, #tpu.memory_space<vmem>>, vector<1x16x128xbf16>
    %9 = vector.shape_cast %8 : vector<1x16x128xbf16> to vector<16x128xbf16>
    %c0_8 = arith.constant 0 : index
    %c128 = arith.constant 128 : index
    %c0_9 = arith.constant 0 : index
    %10 = vector.load %arg6[%c0_8, %c128, %c0_9] : memref<1x1152x128xbf16, #tpu.memory_space<vmem>>, vector<1x128x128xbf16>
    %11 = vector.shape_cast %10 : vector<1x128x128xbf16> to vector<128x128xbf16>
    %cst_10 = arith.constant dense<0.000000e+00> : vector<16x128xf32>
    %12 = tpu.matmul %9, %11, %cst_10 {dimension_numbers = #tpu.dot_dimension_numbers<[1], [0], [0], [1], [0, 0, 1, 1], [], []>} : vector<16x128xbf16>, vector<128x128xbf16>, vector<16x128xf32> -> vector<16x128xf32>
    %13 = arith.addf %7, %12 : vector<16x128xf32>
    %c2 = arith.constant 2 : index
    %c0_11 = arith.constant 0 : index
    %c0_12 = arith.constant 0 : index
    %14 = vector.load %arg8[%c2, %c0_11, %c0_12] : memref<9x16x128xbf16, #tpu.memory_space<vmem>>, vector<1x16x128xbf16>
    %15 = vector.shape_cast %14 : vector<1x16x128xbf16> to vector<16x128xbf16>
    %c0_13 = arith.constant 0 : index
    %c256 = arith.constant 256 : index
    %c0_14 = arith.constant 0 : index
    %16 = vector.load %arg6[%c0_13, %c256, %c0_14] : memref<1x1152x128xbf16, #tpu.memory_space<vmem>>, vector<1x128x128xbf16>
    %17 = vector.shape_cast %16 : vector<1x128x128xbf16> to vector<128x128xbf16>
    %cst_15 = arith.constant dense<0.000000e+00> : vector<16x128xf32>
    %18 = tpu.matmul %15, %17, %cst_15 {dimension_numbers = #tpu.dot_dimension_numbers<[1], [0], [0], [1], [0, 0, 1, 1], [], []>} : vector<16x128xbf16>, vector<128x128xbf16>, vector<16x128xf32> -> vector<16x128xf32>
    %19 = arith.addf %13, %18 : vector<16x128xf32>
    %c3 = arith.constant 3 : index
    %c0_16 = arith.constant 0 : index
    %c0_17 = arith.constant 0 : index
    %20 = vector.load %arg8[%c3, %c0_16, %c0_17] : memref<9x16x128xbf16, #tpu.memory_space<vmem>>, vector<1x16x128xbf16>
    %21 = vector.shape_cast %20 : vector<1x16x128xbf16> to vector<16x128xbf16>
    %c0_18 = arith.constant 0 : index
    %c384 = arith.constant 384 : index
    %c0_19 = arith.constant 0 : index
    %22 = vector.load %arg6[%c0_18, %c384, %c0_19] : memref<1x1152x128xbf16, #tpu.memory_space<vmem>>, vector<1x128x128xbf16>
    %23 = vector.shape_cast %22 : vector<1x128x128xbf16> to vector<128x128xbf16>
    %cst_20 = arith.constant dense<0.000000e+00> : vector<16x128xf32>
    %24 = tpu.matmul %21, %23, %cst_20 {dimension_numbers = #tpu.dot_dimension_numbers<[1], [0], [0], [1], [0, 0, 1, 1], [], []>} : vector<16x128xbf16>, vector<128x128xbf16>, vector<16x128xf32> -> vector<16x128xf32>
    %25 = arith.addf %19, %24 : vector<16x128xf32>
    %c4 = arith.constant 4 : index
    %c0_21 = arith.constant 0 : index
    %c0_22 = arith.constant 0 : index
    %26 = vector.load %arg8[%c4, %c0_21, %c0_22] : memref<9x16x128xbf16, #tpu.memory_space<vmem>>, vector<1x16x128xbf16>
    %27 = vector.shape_cast %26 : vector<1x16x128xbf16> to vector<16x128xbf16>
    %c0_23 = arith.constant 0 : index
    %c512 = arith.constant 512 : index
    %c0_24 = arith.constant 0 : index
    %28 = vector.load %arg6[%c0_23, %c512, %c0_24] : memref<1x1152x128xbf16, #tpu.memory_space<vmem>>, vector<1x128x128xbf16>
    %29 = vector.shape_cast %28 : vector<1x128x128xbf16> to vector<128x128xbf16>
    %cst_25 = arith.constant dense<0.000000e+00> : vector<16x128xf32>
    %30 = tpu.matmul %27, %29, %cst_25 {dimension_numbers = #tpu.dot_dimension_numbers<[1], [0], [0], [1], [0, 0, 1, 1], [], []>} : vector<16x128xbf16>, vector<128x128xbf16>, vector<16x128xf32> -> vector<16x128xf32>
    %31 = arith.addf %25, %30 : vector<16x128xf32>
    %c5 = arith.constant 5 : index
    %c0_26 = arith.constant 0 : index
    %c0_27 = arith.constant 0 : index
    %32 = vector.load %arg8[%c5, %c0_26, %c0_27] : memref<9x16x128xbf16, #tpu.memory_space<vmem>>, vector<1x16x128xbf16>
    %33 = vector.shape_cast %32 : vector<1x16x128xbf16> to vector<16x128xbf16>
    %c0_28 = arith.constant 0 : index
    %c640 = arith.constant 640 : index
    %c0_29 = arith.constant 0 : index
    %34 = vector.load %arg6[%c0_28, %c640, %c0_29] : memref<1x1152x128xbf16, #tpu.memory_space<vmem>>, vector<1x128x128xbf16>
    %35 = vector.shape_cast %34 : vector<1x128x128xbf16> to vector<128x128xbf16>
    %cst_30 = arith.constant dense<0.000000e+00> : vector<16x128xf32>
    %36 = tpu.matmul %33, %35, %cst_30 {dimension_numbers = #tpu.dot_dimension_numbers<[1], [0], [0], [1], [0, 0, 1, 1], [], []>} : vector<16x128xbf16>, vector<128x128xbf16>, vector<16x128xf32> -> vector<16x128xf32>
    %37 = arith.addf %31, %36 : vector<16x128xf32>
    %c6 = arith.constant 6 : index
    %c0_31 = arith.constant 0 : index
    %c0_32 = arith.constant 0 : index
    %38 = vector.load %arg8[%c6, %c0_31, %c0_32] : memref<9x16x128xbf16, #tpu.memory_space<vmem>>, vector<1x16x128xbf16>
    %39 = vector.shape_cast %38 : vector<1x16x128xbf16> to vector<16x128xbf16>
    %c0_33 = arith.constant 0 : index
    %c768 = arith.constant 768 : index
    %c0_34 = arith.constant 0 : index
    %40 = vector.load %arg6[%c0_33, %c768, %c0_34] : memref<1x1152x128xbf16, #tpu.memory_space<vmem>>, vector<1x128x128xbf16>
    %41 = vector.shape_cast %40 : vector<1x128x128xbf16> to vector<128x128xbf16>
    %cst_35 = arith.constant dense<0.000000e+00> : vector<16x128xf32>
    %42 = tpu.matmul %39, %41, %cst_35 {dimension_numbers = #tpu.dot_dimension_numbers<[1], [0], [0], [1], [0, 0, 1, 1], [], []>} : vector<16x128xbf16>, vector<128x128xbf16>, vector<16x128xf32> -> vector<16x128xf32>
    %43 = arith.addf %37, %42 : vector<16x128xf32>
    %c7 = arith.constant 7 : index
    %c0_36 = arith.constant 0 : index
    %c0_37 = arith.constant 0 : index
    %44 = vector.load %arg8[%c7, %c0_36, %c0_37] : memref<9x16x128xbf16, #tpu.memory_space<vmem>>, vector<1x16x128xbf16>
    %45 = vector.shape_cast %44 : vector<1x16x128xbf16> to vector<16x128xbf16>
    %c0_38 = arith.constant 0 : index
    %c896 = arith.constant 896 : index
    %c0_39 = arith.constant 0 : index
    %46 = vector.load %arg6[%c0_38, %c896, %c0_39] : memref<1x1152x128xbf16, #tpu.memory_space<vmem>>, vector<1x128x128xbf16>
    %47 = vector.shape_cast %46 : vector<1x128x128xbf16> to vector<128x128xbf16>
    %cst_40 = arith.constant dense<0.000000e+00> : vector<16x128xf32>
    %48 = tpu.matmul %45, %47, %cst_40 {dimension_numbers = #tpu.dot_dimension_numbers<[1], [0], [0], [1], [0, 0, 1, 1], [], []>} : vector<16x128xbf16>, vector<128x128xbf16>, vector<16x128xf32> -> vector<16x128xf32>
    %49 = arith.addf %43, %48 : vector<16x128xf32>
    %c8 = arith.constant 8 : index
    %c0_41 = arith.constant 0 : index
    %c0_42 = arith.constant 0 : index
    %50 = vector.load %arg8[%c8, %c0_41, %c0_42] : memref<9x16x128xbf16, #tpu.memory_space<vmem>>, vector<1x16x128xbf16>
    %51 = vector.shape_cast %50 : vector<1x16x128xbf16> to vector<16x128xbf16>
    %c0_43 = arith.constant 0 : index
    %c1024 = arith.constant 1024 : index
    %c0_44 = arith.constant 0 : index
    %52 = vector.load %arg6[%c0_43, %c1024, %c0_44] : memref<1x1152x128xbf16, #tpu.memory_space<vmem>>, vector<1x128x128xbf16>
    %53 = vector.shape_cast %52 : vector<1x128x128xbf16> to vector<128x128xbf16>
    %cst_45 = arith.constant dense<0.000000e+00> : vector<16x128xf32>
    %54 = tpu.matmul %51, %53, %cst_45 {dimension_numbers = #tpu.dot_dimension_numbers<[1], [0], [0], [1], [0, 0, 1, 1], [], []>} : vector<16x128xbf16>, vector<128x128xbf16>, vector<16x128xf32> -> vector<16x128xf32>
    %55 = arith.addf %49, %54 : vector<16x128xf32>
    %c0_46 = arith.constant 0 : index
    %c0_47 = arith.constant 0 : index
    %56 = vector.load %arg7[%c0_46, %c0_47] : memref<16x128xf32, #tpu.memory_space<vmem>>, vector<16x128xf32>
    tpu.vector_store %arg7[%c0_46, %c0_47], %55 {strides = array<i32>} : memref<16x128xf32, #tpu.memory_space<vmem>>, vector<16x128xf32>,
    return
  }
  func.func @transform_0(%arg0: i32, %arg1: i32) -> (i32, i32) {
    %c0_i32 = arith.constant 0 : i32
    %c0_i32_0 = arith.constant 0 : i32
    return %arg0, %c0_i32 : i32, i32
  }
  func.func @transform_1(%arg0: i32, %arg1: i32) -> (i32, i32) {
    %c0_i32 = arith.constant 0 : i32
    %c0_i32_0 = arith.constant 0 : i32
    %c0_i32_1 = arith.constant 0 : i32
    return %c0_i32, %c0_i32_0 : i32, i32
  }
  func.func @transform_2(%arg0: i32, %arg1: i32) -> (i32, i32, i32) {
    %c0_i32 = arith.constant 0 : i32
    %c0_i32_0 = arith.constant 0 : i32
    %c0_i32_1 = arith.constant 0 : i32
    %c0_i32_2 = arith.constant 0 : i32
    return %c0_i32, %c0_i32_0, %c0_i32_1 : i32, i32, i32
  }
  func.func @transform_3(%arg0: i32, %arg1: i32) -> (i32, i32, i32) {
    %c0_i32 = arith.constant 0 : i32
    %c0_i32_0 = arith.constant 0 : i32
    %c0_i32_1 = arith.constant 0 : i32
    %c0_i32_2 = arith.constant 0 : i32
    return %c0_i32, %c0_i32_0, %c0_i32_1 : i32, i32, i32
  }
  func.func @transform_4(%arg0: i32, %arg1: i32) -> (i32, i32, i32) {
    %c0_i32 = arith.constant 0 : i32
    %c0_i32_0 = arith.constant 0 : i32
    %c0_i32_1 = arith.constant 0 : i32
    return %arg1, %c0_i32, %c0_i32_0 : i32, i32, i32
  }
  func.func @transform_5(%arg0: i32, %arg1: i32) -> (i32, i32) {
    %c0_i32 = arith.constant 0 : i32
    return %arg0, %arg1 : i32, i32
  }
}

</mosaic_0001>

<bundles_post_ra>
// kernel: tpu_custom_call.1
= control target key start
LH: loop header
LB: loop body
LE: loop exit
PB: predicated region body
PF: predicated region fallthrough
CT: control target
= control target key end

     0   :  { %10 = vsyncpa [#allocation4], 0  ;;  %s4208_s0 = inlined_call_operand.vmem [shape: f32[16,128], index: 0, kind: input, shape index: {}]   ;;  %s4209_s1 = inlined_call_operand.vmem [shape: f32[12,128], index: 1, kind: input, shape index: {}]   ;;  %s4210_s2 = inlined_call_operand.vmem [shape: f32[3,10,128], index: 2, kind: input, shape index: {}]   ;;  %s4211_s3 = inlined_call_operand.vmem [shape: f32[3,10,128], index: 3, kind: input, shape index: {}]   ;;  %s4212_s4 = inlined_call_operand.hbm [shape: bf16[1,1152,128], index: 4, kind: input, shape index: {}]   ;;  %s4213_s5 = inlined_call_operand.hbm [shape: f32[16,128], index: 5, kind: output, shape index: {}]  }
   0x1   :  { %11 = vsyncpa [#allocation5], 0  ;;  %s3038_s18 = smov [#allocation3]  }
   0x2   :  { %s25_s19 = sshll.u32 %s3038_s18, 4  ;;  %s26_s19 = int_to_ptr.vmem [resolvable:$true] %s25_s19 }
   0x3   :  { %s3002_s20 = scalar_lea.vmem %s26_s19, 9216  ;;  %p3007_p1 = scmp.lt.s32.totalorder %s26_s19, %s26_s19 }
   0x4   :  { %p3003_p0 = scmp.ne.s32.totalorder %s26_s19, %s3002_s20  ;;  %p3008_p2 = scmp.lt.s32.totalorder %s3002_s20, %s3002_s20 }
   0x6   :  { %p3009_p3 = por %p3008_p2, %p3007_p1 }
   0x8   :  { %p3010_p4 = pnand %p3009_p3, %p3003_p0 }
   0xa   :  { %3013 = shalt.err (!%p3010_p4)
}
   0xb   :  { %s3039_s21 = smov 64   ;;  %s3040_s22 = smov 4  }
   0xc   :  { %31 = dma.hbm_to_vmem [thread:$0]  %s4212_s4, 9216, %s26_s19, [#allocation4], %s3039_s21, %s3039_s21, %s3040_s22  }
   0xd   :  { %3034 = dma.done.wait [#allocation4], 9216  }
   0xe   :  { %3035 = vsyncadd [#allocation4], 4294958080  ;;  %v3041_v0 = vmov 0.0   ;;  %vm4214_vm0 = vmmov 0   ;;  %v2896_v1 = vld [vmem:[#allocation3 + $0x78] sm:$0xff]   ;;  %v2897_v2 = vld [vmem:[#allocation3 + $0x70] sm:$0xff]   ;;  %v74_v6 = vlaneseq }
   0xf   :  { %2707 = vmatprep.subr.bf16.mxu0 %v3041_v0  ;;  %2727 = vmatprep.subr.bf16.mxu1 %v3041_v0  ;;  %v2899_v3 = vld [vmem:[#allocation3 + $0x38] sm:$0xff]   ;;  %v3043_v4 = vmov 1966171168   ;;  %v2901_v7 = vld [vmem:[#allocation3 + $0x30] sm:$0xff]   ;;  %v2898_v8 = vld [vmem:[#allocation3 + $0x68] sm:$0xff]  }
  0x10   :  { %2723 = vmatprep.mubr.msk.bf16.mxu0 %vm4214_vm0, %v3041_v0  ;;  %2743 = vmatprep.mubr.msk.bf16.mxu1 %vm4214_vm0, %v3041_v0  ;;  %v72_v5 = vunpack.c.l.s4 %v3043_v4  ;;  %v75_v10 = vshrl.u32 %v74_v6, 7  ;;  %v2903_v11 = vld [vmem:[#allocation3 + $0x28] sm:$0xff]   ;;  %v2900_v12 = vld [vmem:[#allocation3 + $0x60] sm:$0xff]   ;;  %v2902_v15 = vld [vmem:[#allocation3 + $0x58] sm:$0xff]  }
  0x11   :  { %2708 = vmatpush3.bf16.msra.mxu0 %v2896_v1  ;;  %2728 = vmatpush3.bf16.msra.mxu1 %v2899_v3  ;;  %v2905_v14 = vld [vmem:[#allocation3 + $0x20] sm:$0xff]   ;;  %v66_v16 = vld [vmem:[%s4209_s1] sm:$0xff]  ;;  %v3124_v26 = vld [vmem:[%s4210_s2 + $0x10] sm:$0xff] }
  0x12   :  { %2709 = vmatprep.subr.bf16.mxu0 %v3041_v0  ;;  %2729 = vmatprep.subr.bf16.mxu1 %v3041_v0  ;;  %v73_v9 = vunpack.c.0.s8 %v72_v5  ;;  %v70_v17 = vcombine.high %v66_v16, %v66_v16  ;;  %v3099_v19 = vsub.s32 0, %v75_v10  ;;  %v3104_v20 = vld [vmem:[%s4210_s2] sm:$0xff]  ;;  %v2904_v32 = vld [vmem:[#allocation3 + $0x50] sm:$0xff]   ;;  %v2906_v41 = vld [vmem:[#allocation3 + $0x48] sm:$0xff]  }
  0x13   :  { %v3109_v21 = vld [vmem:[%s4211_s3] sm:$0xff]  ;;  %v317_v22 = vcombine.high %v3104_v20, %v3104_v20  ;;  %v3147_v42 = vld [vmem:[%s4208_s0 + $0x8] sm:$0xff]  ;;  %v2909_v47 = vld [vmem:[#allocation3 + $0x10] sm:$0xff]  }
  0x14   :  { %v3091_v13 = vsub.s32 %v73_v9, %v75_v10  ;;  %v2907_v27 = vld [vmem:[#allocation3 + $0x18] sm:$0xff]   ;;  %v2423_v58 = vmul.f32 -1.442695, %v3147_v42  ;;  %v2918_v61 = vld [vmem:[#allocation3 + $0x8] sm:$0xff]   ;;  %v2908_v62 = vld [vmem:[#allocation3 + $0x40] sm:$0xff]  }
  0x15   :  { %2710 = vmatpush3.bf16.msra.mxu0 %v2897_v2  ;;  %2730 = vmatpush3.bf16.msra.mxu1 %v2901_v7  ;;  %v3140_v36 = vld [vmem:[%s4208_s0] sm:$0xff]  ;;  %v2920_v1 = vld [vmem:[#allocation3] sm:$0xff]  }
  0x16   :  { %2711 = vmatprep.subr.bf16.mxu0 %v3041_v0  ;;  %2731 = vmatprep.subr.bf16.mxu1 %v3041_v0  ;;  %v77_v18 = vrot.slane %v66_v16, %v3091_v13  ;;  %v324_v23 = vrot.slane %v3104_v20, %v3091_v13  ;;  %v3119_v25 = vrot.slane %v3109_v21, %v3091_v13  ;;  %v2422_v54 = vmul.f32 -1.442695, %v3140_v36 }
  0x17   :  { %v84_v28 = vrot.slane %v70_v17, %v3091_v13 }
  0x18   :  { %v85_v29 = vcombine.high %v77_v18, %v77_v18  ;;  %v93_v30 = vrot.slane %v77_v18, %v3091_v13  ;;  %v332_v33 = vcombine.high %v324_v23, %v324_v23  ;;  %v3132_v34 = vrot.slane %v324_v23, %v3091_v13 }
  0x19   :  { %2712 = vmatpush3.bf16.msra.mxu0 %v2898_v8  ;;  %2732 = vmatpush3.bf16.msra.mxu1 %v2903_v11  ;;  %v407_v35 = vcombine.high %v3119_v25, %v3119_v25  ;;  %v86_v37 = vcombine.high %v84_v28, %v84_v28  ;;  %v100_v38 = vrot.slane %v84_v28, %v3091_v13  ;;  %2984 = vpow2.f32 %v2422_v54 }
  0x1a   :  { %2713 = vmatprep.subr.bf16.mxu0 %v3041_v0  ;;  %2733 = vmatprep.subr.bf16.mxu1 %v3041_v0  ;;  %v107_v39 = vrot.slane %v85_v29, %v3091_v13  ;;  %v115_v40 = vcombine.high %v93_v30, %v93_v30  ;;  %v146_v43 = vrot.slane %v93_v30, %v3099_v19  ;;  %2986 = vpow2.f32 %v2423_v58 }
  0x1b   :  { %v3151_v44 = vrot.slane %v332_v33, %v3091_v13  ;;  %v362_v45 = vcombine.high %v3132_v34, %v3132_v34  ;;  %v3157_v46 = vrot.slane %v3119_v25, %v3091_v13  ;;  %v114_v48 = vrot.slane %v86_v37, %v3091_v13 }
  0x1c   :  { %v116_v49 = vcombine.high %v100_v38, %v100_v38  ;;  %v117_v50 = vcombine.high %v107_v39, %v107_v39  ;;  %v150_v51 = vrot.slane %v107_v39, %v3099_v19  ;;  %v3163_v52 = vrot.slane %v115_v40, %v3099_v19 }
  0x1d   :  { %2714 = vmatpush3.bf16.msra.mxu0 %v2900_v12  ;;  %2734 = vmatpush3.bf16.msra.mxu1 %v2905_v14  ;;  %v3166_v53 = vrot.slane %v100_v38, %v3099_v19  ;;  %vm198_vm1 = vcmp.ge.f32.partialorder %v3140_v36, %v146_v43  ;;  %v118_v55 = vcombine.high %v114_v48, %v114_v48 }
  0x1e   :  { %2715 = vmatprep.subr.bf16.mxu0 %v3041_v0  ;;  %2735 = vmatprep.subr.bf16.mxu1 %v3041_v0  ;;  %v3172_v56 = vrot.slane %v117_v50, %v3099_v19  ;;  %v3175_v57 = vrot.slane %v114_v48, %v3099_v19  ;;  %v3179_v59 = vrot.slane %v116_v49, %v3099_v19 }
  0x1f   :  { %vm199_vm2 = vcmp.ge.f32.partialorder %v3147_v42, %v146_v43  ;;  %vm200_vm3 = vcmp.ge.f32.partialorder %v3140_v36, %v150_v51  ;;  %vm201_vm4 = vcmp.ge.f32.partialorder %v3147_v42, %v150_v51  ;;  %v3185_v60 = vrot.slane %v118_v55, %v3099_v19 }
  0x20   :  { %vm202_vm5 = vcmp.ge.f32.partialorder %v3140_v36, %v3163_v52  ;;  %vm225_vm8 = vcmp.lt.f32.partialorder %v3140_v36, %v150_v51  ;;  %vm226_vm9 = vcmp.lt.f32.partialorder %v3147_v42, %v150_v51  ;;  %vm227_vm10 = vcmp.lt.f32.partialorder %v3140_v36, %v3163_v52 }
  0x21   :  { %2716 = vmatpush3.bf16.msra.mxu0 %v2902_v15  ;;  %2736 = vmatpush3.bf16.msra.mxu1 %v2907_v27  ;;  %vm228_vm12 = vcmp.lt.f32.partialorder %v3147_v42, %v3163_v52  ;;  %vm229_vm13 = vcmp.lt.f32.partialorder %v3140_v36, %v3172_v56  ;;  %vm247_vm14 = vmand %vm198_vm1, %vm225_vm8  ;;  %vm230_vm15 = vcmp.lt.f32.partialorder %v3147_v42, %v3172_v56 }
  0x22   :  { %2717 = vmatprep.subr.bf16.mxu0 %v3041_v0  ;;  %2737 = vmatprep.subr.bf16.mxu1 %v3041_v0  ;;  %vm231_vm0 = vcmp.lt.f32.partialorder %v3140_v36, %v3166_v53  ;;  %vm232_vm7 = vcmp.lt.f32.partialorder %v3147_v42, %v3166_v53  ;;  %vm248_vm11 = vmand %vm199_vm2, %vm226_vm9  ;;  %v2427_v63 = vsel %vm247_vm14, 1.0, %v3041_v0  ;;  %v364_v3 = vcombine.high %v3151_v44, %v3151_v44 }
  0x23   :  { %vm249_vm6 = vmand %vm200_vm3, %vm227_vm10  ;;  %v2428_v2 = vsel %vm248_vm11, 1.0, %v3041_v0  ;;  %v3222_v4 = vrot.slane %v407_v35, %v3091_v13  ;;  %v437_v5 = vcombine.high %v3157_v46, %v3157_v46  ;;  %v3239_v8 = vsub.f32 %v3140_v36, %v146_v43 }
  0x24   :  { %vm3231_vm1 = vmand %vm201_vm4, %vm228_vm12  ;;  %v3236_v7 = vsel %vm249_vm6, 1.0, %v3041_v0  ;;  %v3242_v9 = vsub.f32 %v3147_v42, %v146_v43  ;;  %v3245_v10 = vsub.f32 %v3140_v36, %v150_v51  ;;  %v3258_v12 = vsub.f32 %v3147_v42, %v150_v51 }
  0x25   :  { %2718 = vmatpush3.bf16.msra.mxu0 %v2904_v32  ;;  %2738 = vmatpush3.bf16.msra.mxu1 %v2909_v47  ;;  %vm251_vm2 = vmand %vm202_vm5, %vm229_vm13  ;;  %v439_v11 = vcombine.high %v3222_v4, %v3222_v4  ;;  %v3262_v14 = vsub.f32 %v3140_v36, %v3163_v52  ;;  %v3266_v15 = vsub.f32 %v3147_v42, %v3163_v52  ;;  %v2430_v27 = vsel %vm3231_vm1, 1.0, %v3041_v0 }
  0x26   :  { %2719 = vmatprep.subr.bf16.mxu0 %v3041_v0  ;;  %2739 = vmatprep.subr.bf16.mxu1 %v3041_v0  ;;  %vm4218_vm3 = vcmp.ge.f32.partialorder %v3147_v42, %v3163_v52  ;;  %v3276_v16 = vsub.f32 %v3140_v36, %v3172_v56  ;;  %v3280_v17 = vsub.f32 %v3147_v42, %v3172_v56  ;;  %v2431_v28 = vsel %vm251_vm2, 1.0, %v3041_v0 }
  0x27   :  { %vm252_vm4 = vmand %vm4218_vm3, %vm230_vm15  ;;  %v486_v18 = vrot.slane %v3132_v34, %v3099_v19  ;;  %v490_v23 = vrot.slane %v3151_v44, %v3099_v19  ;;  %vm4219_vm5 = vcmp.ge.f32.partialorder %v3140_v36, %v3172_v56  ;;  %v494_v29 = vrot.slane %v362_v45, %v3099_v19 }
  0x28   :  { %vm3292_vm6 = vmand %vm4219_vm5, %vm231_vm0  ;;  %v498_v30 = vrot.slane %v364_v3, %v3099_v19  ;;  %vm4222_vm0 = vcmp.ge.f32.partialorder %v3147_v42, %v3172_v56  ;;  %v2432_v32 = vsel %vm252_vm4, 1.0, %v3041_v0  ;;  %v573_v40 = vsub.f32 %v3163_v52, %v3140_v36 }
  0x29   :  { %2720 = vmatpush3.bf16.msra.mxu0 %v2906_v41  ;;  %2740 = vmatpush3.bf16.msra.mxu1 %v2918_v61  ;;  %vm254_vm8 = vmand %vm4222_vm0, %vm232_vm7  ;;  %v533_v33 = vmul.f32 %v486_v18, %v3239_v8  ;;  %v534_v35 = vmul.f32 %v486_v18, %v3242_v9  ;;  %v535_v37 = vmul.f32 %v490_v23, %v3245_v10  ;;  %v2433_v41 = vsel %vm3292_vm6, 1.0, %v3041_v0  ;;  %v3335_v61 = vld [vmem:[%s4211_s3 + $0x10] sm:$0xff] }
  0x2a   :  { %2721 = vmatprep.subr.bf16.mxu0 %v3041_v0  ;;  %2741 = vmatprep.subr.bf16.mxu1 %v3041_v0  ;;  %v536_v34 = vmul.f32 %v490_v23, %v3258_v12  ;;  %v537_v38 = vmul.f32 %v494_v29, %v3262_v14  ;;  %v538_v39 = vmul.f32 %v494_v29, %v3266_v15  ;;  %v2434_v43 = vsel %vm254_vm8, 1.0, %v3041_v0 }
  0x2b   :  { %v539_v44 = vmul.f32 %v498_v30, %v3276_v16  ;;  %v540_v45 = vmul.f32 %v498_v30, %v3280_v17  ;;  %v553_v47 = vmul.f32 %v2427_v63, %v533_v33  ;;  %v554_v48 = vmul.f32 %v2428_v2, %v534_v35 }
  0x2c   :  { %v555_v49 = vmul.f32 %v3236_v7, %v535_v37  ;;  %v556_v50 = vmul.f32 %v2430_v27, %v536_v34  ;;  %v557_v51 = vmul.f32 %v2431_v28, %v537_v38  ;;  %v558_v54 = vmul.f32 %v2432_v32, %v538_v39 }
  0x2d   :  { %2722 = vmatpush3.bf16.msra.mxu0 %v2908_v62  ;;  %2742 = vmatpush3.bf16.msra.mxu1 %v2920_v1  ;;  %v574_v55 = vsub.f32 %v3163_v52, %v3147_v42  ;;  %v575_v58 = vsub.f32 %v3172_v56, %v3140_v36  ;;  %v3337_v62 = vpop.eup %2984  ;;  %v576_v63 = vsub.f32 %v3172_v56, %v3147_v42  ;;  %vm4229_vm5 = vmmov 0  }
  0x2e   :  { %2747 = vmatprep.subr.bf16.mxu0 %v3041_v0  ;;  %2767 = vmatprep.subr.bf16.mxu1 %v3041_v0  ;;  %v3343_v1 = vsub.f32 %v3166_v53, %v3140_v36  ;;  %v3347_v52 = vsub.f32 %v3166_v53, %v3147_v42  ;;  %v596_v2 = vrot.slane %v3157_v46, %v3099_v19  ;;  %v3351_v3 = vpop.eup %2986 }
  0x2f   :  { %v3353_v6 = vmul.f32 %v2433_v41, %v539_v44  ;;  %v600_v18 = vrot.slane %v3222_v4, %v3099_v19  ;;  %v604_v56 = vrot.slane %v437_v5, %v3099_v19  ;;  %v715_v23 = vrot.slane %v3124_v26, %v3091_v13 }
  0x30   :  { %v3360_v25 = vmul.f32 %v2434_v43, %v540_v45  ;;  %v643_v29 = vmul.f32 %v596_v2, %v573_v40  ;;  %v644_v30 = vmul.f32 %v596_v2, %v574_v55  ;;  %v783_v33 = vrot.slane %v3335_v61, %v3091_v13  ;;  %v3373_v2 = vld [vmem:[%s4210_s2 + $0x20] sm:$0xff] }
  0x31   :  { %v645_v46 = vmul.f32 %v600_v18, %v575_v58  ;;  %v646_v35 = vmul.f32 %v600_v18, %v576_v63  ;;  %v647_v37 = vmul.f32 %v604_v56, %v3343_v1  ;;  %v648_v34 = vmul.f32 %v604_v56, %v3347_v52 }
  0x32   :  { %v663_v38 = vmul.f32 %v3236_v7, %v643_v29  ;;  %v664_v39 = vmul.f32 %v2430_v27, %v644_v30  ;;  %v723_v5 = vcombine.high %v715_v23, %v715_v23  ;;  %v3368_v44 = vrot.slane %v715_v23, %v3091_v13  ;;  %v3394_v30 = vld [vmem:[%s4211_s3 + $0x20] sm:$0xff] }
  0x33   :  { %v665_v45 = vmul.f32 %v2431_v28, %v645_v46  ;;  %v666_v31 = vmul.f32 %v2432_v32, %v646_v35  ;;  %v667_v40 = vmul.f32 %v2433_v41, %v647_v37  ;;  %v668_v55 = vmul.f32 %v2434_v43, %v648_v34 }
  0x34   :  { %v683_v18 = vadd.f32 %v663_v38, %v553_v47  ;;  %v3376_v24 = vrot.slane %v723_v5, %v3091_v13  ;;  %v684_v56 = vadd.f32 %v664_v39, %v554_v48  ;;  %v753_v41 = vcombine.high %v3368_v44, %v3368_v44 }
  0x35   :  { %v685_v28 = vadd.f32 %v665_v45, %v555_v49  ;;  %v686_v32 = vadd.f32 %v666_v31, %v556_v50  ;;  %v3384_v43 = vadd.f32 %v667_v40, %v557_v51  ;;  %v791_v23 = vcombine.high %v783_v33, %v783_v33 }
  0x36   :  { %v3387_v47 = vrot.slane %v783_v33, %v3091_v13  ;;  %v842_v29 = vrot.slane %v3368_v44, %v3099_v19  ;;  %v3396_v48 = vadd.f32 %v668_v55, %v558_v54  ;;  %v846_v49 = vrot.slane %v3376_v24, %v3099_v19 }
  0x37   :  { %v3404_v50 = vrot.slane %v3373_v2, %v3091_v13  ;;  %v3407_v51 = vrot.slane %v791_v23, %v3091_v13  ;;  %v3419_v38 = vrot.slane %v3394_v30, %v3091_v13  ;;  %vm206_vm7 = vcmp.ge.f32.partialorder %v3140_v36, %v3166_v53 }
  0x38   :  { %v884_v33 = vmul.f32 %v842_v29, %v3239_v8  ;;  %v885_v46 = vmul.f32 %v842_v29, %v3242_v9  ;;  %v886_v35 = vmul.f32 %v846_v49, %v3245_v10  ;;  %v887_v37 = vmul.f32 %v846_v49, %v3258_v12 }
  0x39   :  { %v923_v34 = vrot.slane %v3387_v47, %v3099_v19  ;;  %v821_v39 = vcombine.high %v3387_v47, %v3387_v47  ;;  %v927_v45 = vrot.slane %v3407_v51, %v3099_v19  ;;  %v1037_v40 = vcombine.high %v3404_v50, %v3404_v50 }
  0x3a   :  { %v902_v5 = vmul.f32 %v884_v33, %v683_v18  ;;  %v903_v55 = vmul.f32 %v885_v46, %v684_v56  ;;  %v904_v23 = vmul.f32 %v886_v35, %v685_v28  ;;  %v905_v54 = vmul.f32 %v887_v37, %v686_v32 }
  0x3b   :  { %v965_v29 = vmul.f32 %v923_v34, %v575_v58  ;;  %v966_v49 = vmul.f32 %v923_v34, %v576_v63  ;;  %v967_v27 = vmul.f32 %v927_v45, %v3343_v1  ;;  %v968_v7 = vmul.f32 %v927_v45, %v3347_v52 }
  0x3c   :  { %v3431_v31 = vrot.slane %v3404_v50, %v3091_v13  ;;  %v3435_v33 = vrot.slane %v3419_v38, %v3091_v13  ;;  %v48_v56 = vadd.f32 1.0, %v3337_v62  ;;  %v823_v58 = vcombine.high %v3407_v51, %v3407_v51 }
  0x3d   :  { %v983_v18 = vmul.f32 %v965_v29, %v685_v28  ;;  %v984_v47 = vmul.f32 %v966_v49, %v686_v32  ;;  %v985_v63 = vmul.f32 %v967_v27, %v3384_v43  ;;  %v986_v46 = vmul.f32 %v968_v7, %v3396_v48 }
  0x3e   :  { %v1126_v35 = vrot.slane %v3431_v31, %v3099_v19  ;;  %v1089_v28 = vcombine.high %v3419_v38, %v3419_v38  ;;  %v1198_v32 = vrot.slane %v3435_v33, %v3099_v19  ;;  %v49_v49 = vadd.f32 1.0, %v3351_v3 }
  0x3f   :  { %v1001_v50 = vadd.f32 %v983_v18, %v902_v5  ;;  %v1002_v37 = vadd.f32 %v984_v47, %v903_v55  ;;  %v1003_v34 = vadd.f32 %v985_v63, %v904_v23  ;;  %v1004_v62 = vadd.f32 %v986_v46, %v905_v54 }
  0x40   :  { %v1163_v45 = vmul.f32 %v1126_v35, %v3239_v8  ;;  %v1164_v29 = vmul.f32 %v1126_v35, %v3242_v9  ;;  %v1235_v27 = vmul.f32 %v1198_v32, %v3343_v1  ;;  %v1236_v7 = vmul.f32 %v1198_v32, %v3347_v52 }
  0x41   :  { %2988 = vrcp.f32 %v48_v56  ;;  %vm207_vm9 = vcmp.ge.f32.partialorder %v3147_v42, %v3166_v53  ;;  %vm233_vm10 = vcmp.lt.f32.partialorder %v3140_v36, %v3175_v57  ;;  %vm234_vm11 = vcmp.lt.f32.partialorder %v3147_v42, %v3175_v57 }
  0x42   :  { %v1179_v5 = vmul.f32 %v1163_v45, %v1001_v50  ;;  %v1180_v55 = vmul.f32 %v1164_v29, %v1002_v37  ;;  %v1251_v54 = vmul.f32 %v1235_v27, %v1003_v34  ;;  %v1252_v38 = vmul.f32 %v1236_v7, %v1004_v62  ;;  %vm255_vm12 = vmand %vm206_vm7, %vm233_vm10 }
  0x43   :  { %2990 = vrcp.f32 %v49_v49  ;;  %v579_v8 = vsub.f32 %v3175_v57, %v3140_v36  ;;  %v580_v9 = vsub.f32 %v3175_v57, %v3147_v42  ;;  %v608_v1 = vrot.slane %v439_v11, %v3099_v19  ;;  %vm256_vm13 = vmand %vm207_vm9, %vm234_vm11 }
  0x44   :  { %v1267_v52 = vadd.f32 %v1251_v54, %v1179_v5  ;;  %v1268_v3 = vadd.f32 %v1252_v38, %v1180_v55  ;;  %v3470_v23 = vsel %vm255_vm12, 1.0, %v3041_v0  ;;  %v850_v18 = vrot.slane %v753_v41, %v3099_v19 }
  0x45   :  { %v3477_v47 = vsel %vm256_vm13, 1.0, %v3041_v0  ;;  %v649_v56 = vmul.f32 %v608_v1, %v579_v8  ;;  %v650_v63 = vmul.f32 %v608_v1, %v580_v9  ;;  %v931_v46 = vrot.slane %v821_v39, %v3099_v19 }
  0x46   :  { %v2582_v4 = vpack.c.bf16 %v1268_v3, %v1267_v52  ;;  %v888_v11 = vmul.f32 %v850_v18, %v3262_v14  ;;  %v889_v35 = vmul.f32 %v850_v18, %v3266_v15  ;;  %v3483_v50 = vrot.slane %v1037_v40, %v3091_v13  ;;  %v2919_v18 = vld [vmem:[#allocation3 + $0xb8] sm:$0xff]  }
  0x47   :  { %v669_v37 = vmul.f32 %v3470_v23, %v649_v56  ;;  %v670_v44 = vmul.f32 %v3477_v47, %v650_v63  ;;  %v969_v41 = vmul.f32 %v931_v46, %v579_v8  ;;  %v970_v32 = vmul.f32 %v931_v46, %v580_v9 }
  0x48   :  { %v1067_v45 = vcombine.high %v3431_v31, %v3431_v31  ;;  %v1119_v39 = vcombine.high %v3435_v33, %v3435_v33  ;;  %2583 = vst [vmem:[#allocation2 + $0x8] sm:$0xff] %v2582_v4   ;;  %v3492_v29 = vrot.slane %v1089_v28, %v3091_v13  ;;  %v1130_v40 = vrot.slane %v3483_v50, %v3099_v19 }
  0x49   :  { %v3497_v27 = vadd.f32 %v669_v37, %v3353_v6  ;;  %v3500_v7 = vadd.f32 %v670_v44, %v3360_v25  ;;  %v906_v49 = vmul.f32 %v888_v11, %v3384_v43  ;;  %v907_v5 = vmul.f32 %v889_v35, %v3396_v48 }
  0x4a   :  { %v1165_v55 = vmul.f32 %v1130_v40, %v3245_v10  ;;  %v1166_v54 = vmul.f32 %v1130_v40, %v3258_v12  ;;  %v1202_v28 = vrot.slane %v3492_v29, %v3099_v19  ;;  %vm208_vm14 = vcmp.ge.f32.partialorder %v3140_v36, %v3175_v57 }
  0x4b   :  { %v987_v6 = vmul.f32 %v969_v41, %v3497_v27  ;;  %v988_v38 = vmul.f32 %v970_v32, %v3500_v7  ;;  %vm209_vm15 = vcmp.ge.f32.partialorder %v3147_v42, %v3175_v57  ;;  %v3518_v10 = vrot.slane %v317_v22, %v3091_v13 }
  0x4c   :  { %v1237_v12 = vmul.f32 %v1202_v28, %v579_v8  ;;  %v1238_v25 = vmul.f32 %v1202_v28, %v580_v9  ;;  %vm235_vm1 = vcmp.lt.f32.partialorder %v3140_v36, %v3179_v59  ;;  %vm236_vm2 = vcmp.lt.f32.partialorder %v3147_v42, %v3179_v59 }
  0x4d   :  { %v3524_v48 = vadd.f32 %v987_v6, %v906_v49  ;;  %v3526_v1 = vadd.f32 %v988_v38, %v907_v5  ;;  %v1181_v52 = vmul.f32 %v1165_v55, %v1003_v34  ;;  %v1182_v3 = vmul.f32 %v1166_v54, %v1004_v62  ;;  %vm3558_vm3 = vmand %vm208_vm14, %vm235_vm1  ;;  %v2921_v54 = vld [vmem:[#allocation3 + $0xb0] sm:$0xff]  }
  0x4e   :  { %v2989_v43 = vpop.eup %2988  ;;  %v3531_v22 = vrot.slane %v3518_v10, %v3091_v13  ;;  %v4223_v8 = vcombine.high %v3109_v21, %v3109_v21  ;;  %v3541_v56 = vsub.f32 %v3140_v36, %v3166_v53  ;;  %v3547_v4 = vsub.f32 %v3147_v42, %v3166_v53  ;;  %vm3576_vm4 = vmand %vm209_vm15, %vm236_vm2 }
  0x4f   :  { %v54_v20 = vmul.f32 %v2989_v43, %v3140_v36  ;;  %v2917_v34 = vld [vmem:[#allocation2 + $0x8] sm:$0xff]   ;;  %v1253_v62 = vmul.f32 %v1237_v12, %v3524_v48  ;;  %v1254_v46 = vmul.f32 %v1238_v25, %v3526_v1  ;;  %v581_v11 = vsub.f32 %v3179_v59, %v3140_v36 }
  0x50   :  { %v3537_v9 = vrot.slane %v4223_v8, %v3091_v13  ;;  %v2991_v63 = vpop.eup %2990  ;;  %v502_v53 = vrot.slane %v3531_v22, %v3099_v19  ;;  %v582_v44 = vsub.f32 %v3179_v59, %v3147_v42  ;;  %2724 = vmatmul.mubr.bf16.vlgmr.msra.gmra.mxu0 %v2917_v34  ;;  %v4228_v49 = vcombine.high %v3376_v24, %v3376_v24  ;;  %v2923_v34 = vld [vmem:[#allocation3 + $0xa8] sm:$0xff]  }
  0x51   :  { %v55_v21 = vmul.f32 %v2991_v63, %v3147_v42  ;;  %v1269_v41 = vadd.f32 %v1253_v62, %v1181_v52  ;;  %v1270_v32 = vadd.f32 %v1254_v46, %v1182_v3  ;;  %v935_v55 = vrot.slane %v823_v58, %v3099_v19  ;;  %2748 = vmatpush3.bf16.msra.mxu0 %v2919_v18 }
  0x52   :  { %v3564_v37 = vrot.slane %v3537_v9, %v3091_v13  ;;  %v854_v5 = vrot.slane %v4228_v49, %v3099_v19  ;;  %2763 = vmatprep.mubr.msk.bf16.mxu0 %vm4229_vm5, %v3041_v0  ;;  %v541_v6 = vmul.f32 %v502_v53, %v3541_v56  ;;  %v542_v38 = vmul.f32 %v502_v53, %v3547_v4  ;;  %v2924_v53 = vld [vmem:[#allocation3 + $0xf8] sm:$0xff]  }
  0x53   :  { %v2577_v28 = vpack.c.bf16 %v55_v21, %v54_v20  ;;  %2749 = vmatprep.subr.bf16.mxu0 %v3041_v0  ;;  %v2587_v12 = vpack.c.bf16 %v1270_v32, %v1269_v41  ;;  %v3600_v58 = vsel %vm3558_vm3, 1.0, %v3041_v0  ;;  %v3605_v43 = vsel %vm3576_vm4, 1.0, %v3041_v0  ;;  %v2925_v41 = vld [vmem:[#allocation3 + $0xa0] sm:$0xff]  }
  0x54   :  { %v612_v24 = vrot.slane %v3564_v37, %v3099_v19  ;;  %v890_v25 = vmul.f32 %v854_v5, %v3276_v16  ;;  %v891_v51 = vmul.f32 %v854_v5, %v3280_v17  ;;  %v561_v52 = vmul.f32 %v3470_v23, %v541_v6 }
  0x55   :  { %2578 = vst [vmem:[#allocation2] sm:$0xff] %v2577_v28   ;;  %v562_v3 = vmul.f32 %v3477_v47, %v542_v38  ;;  %2619 = vst [vmem:[#allocation2 + $0x10] sm:$0xff] %v2587_v12   ;;  %v971_v8 = vmul.f32 %v935_v55, %v581_v11  ;;  %v972_v63 = vmul.f32 %v935_v55, %v582_v44  ;;  %2750 = vmatpush3.bf16.msra.mxu0 %v2921_v54 }
  0x56   :  { %v651_v18 = vmul.f32 %v612_v24, %v581_v11  ;;  %v652_v20 = vmul.f32 %v612_v24, %v582_v44  ;;  %v908_v62 = vmul.f32 %v890_v25, %v3497_v27  ;;  %v909_v46 = vmul.f32 %v891_v51, %v3500_v7  ;;  %2751 = vmatprep.subr.bf16.mxu0 %v3041_v0  ;;  %v2927_v25 = vld [vmem:[#allocation3 + $0x98] sm:$0xff]  }
  0x57   :  { %v1134_v21 = vrot.slane %v1067_v45, %v3099_v19  ;;  %v1206_v23 = vrot.slane %v1119_v39, %v3099_v19  ;;  %vm210_vm6 = vcmp.ge.f32.partialorder %v3140_v36, %v3179_v59  ;;  %vm237_vm0 = vcmp.lt.f32.partialorder %v3140_v36, %v3185_v60 }
  0x58   :  { %v671_v47 = vmul.f32 %v3600_v58, %v651_v18  ;;  %v672_v35 = vmul.f32 %v3605_v43, %v652_v20  ;;  %vm211_vm8 = vcmp.ge.f32.partialorder %v3147_v42, %v3179_v59  ;;  %vm238_vm7 = vcmp.lt.f32.partialorder %v3147_v42, %v3185_v60  ;;  %vm3646_vm9 = vmand %vm210_vm6, %vm237_vm0 }
  0x59   :  { %v1167_v31 = vmul.f32 %v1134_v21, %v3262_v14  ;;  %v1168_v45 = vmul.f32 %v1134_v21, %v3266_v15  ;;  %v1239_v27 = vmul.f32 %v1206_v23, %v581_v11  ;;  %v333_v7 = vcombine.high %v3518_v10, %v3518_v10  ;;  %2752 = vmatpush3.bf16.msra.mxu0 %v2923_v34  ;;  %vm3668_vm10 = vmand %vm211_vm8, %vm238_vm7 }
  0x5a   :  { %v3632_v33 = vadd.f32 %v671_v47, %v561_v52  ;;  %v3634_v39 = vadd.f32 %v672_v35, %v562_v3  ;;  %v1240_v32 = vmul.f32 %v1206_v23, %v582_v44  ;;  %v408_v10 = vcombine.high %v3537_v9, %v3537_v9  ;;  %2753 = vmatprep.subr.bf16.mxu0 %v3041_v0  ;;  %v2928_v35 = vld [vmem:[#allocation3 + $0xe8] sm:$0xff]  }
  0x5b   :  { %v1183_v14 = vmul.f32 %v1167_v31, %v3524_v48  ;;  %v1184_v15 = vmul.f32 %v1168_v45, %v3526_v1  ;;  %v3656_v44 = vrot.slane %v333_v7, %v3091_v13  ;;  %v3660_v49 = vsub.f32 %v3140_v36, %v3175_v57  ;;  %v2929_v31 = vld [vmem:[#allocation3 + $0x90] sm:$0xff]   ;;  %v2931_v9 = vld [vmem:[#allocation3 + $0x88] sm:$0xff]  }
  0x5c   :  { %v2922_v11 = vld [vmem:[#allocation2] sm:$0xff]   ;;  %v989_v48 = vmul.f32 %v971_v8, %v3632_v33  ;;  %v990_v1 = vmul.f32 %v972_v63, %v3634_v39  ;;  %v3673_v5 = vrot.slane %v408_v10, %v3091_v13  ;;  %v3677_v55 = vsub.f32 %v3147_v42, %v3175_v57 }
  0x5d   :  { %v3681_v54 = vsub.f32 %v3185_v60, %v3140_v36  ;;  %v3685_v28 = vsub.f32 %v3185_v60, %v3147_v42  ;;  %2744 = vmatmul.mubr.bf16.vlgmr.msra.gmra.mxu1 %v2922_v11  ;;  %v506_v12 = vrot.slane %v3656_v44, %v3099_v19  ;;  %v4234_v24 = vcombine.high %v3124_v26, %v3124_v26  ;;  %v2926_v36 = vld [vmem:[#allocation3 + $0xf0] sm:$0xff]  }
  0x5e   :  { %v1007_v6 = vadd.f32 %v989_v48, %v908_v62  ;;  %v1008_v38 = vadd.f32 %v990_v1, %v909_v46  ;;  %2768 = vmatpush3.bf16.msra.mxu1 %v2924_v53  ;;  %2754 = vmatpush3.bf16.msra.mxu0 %v2925_v41  ;;  %v3698_v42 = vsel %vm3646_vm9, 1.0, %v3041_v0  ;;  %v616_v51 = vrot.slane %v3673_v5, %v3099_v19  ;;  %v2930_v1 = vld [vmem:[#allocation3 + $0xe0] sm:$0xff]  }
  0x5f   :  { %v3693_v57 = vrot.slane %v4234_v24, %v3091_v13  ;;  %v4235_v52 = vcombine.high %v3335_v61, %v3335_v61  ;;  %v1069_v26 = vcombine.high %v3483_v50, %v3483_v50  ;;  %2769 = vmatprep.subr.bf16.mxu1 %v3041_v0  ;;  %2755 = vmatprep.subr.bf16.mxu0 %v3041_v0  ;;  %v3715_v8 = vsel %vm3668_vm10, 1.0, %v3041_v0 }
  0x60   :  { %v1255_v18 = vmul.f32 %v1239_v27, %v1007_v6  ;;  %v1256_v20 = vmul.f32 %v1240_v32, %v1008_v38  ;;  %v543_v63 = vmul.f32 %v506_v12, %v3660_v49  ;;  %2783 = vmatprep.mubr.msk.bf16.mxu1 %vm4229_vm5, %v3041_v0  ;;  %v544_v61 = vmul.f32 %v506_v12, %v3677_v55 }
  0x61   :  { %v3706_v3 = vrot.slane %v4235_v52, %v3091_v13  ;;  %v653_v50 = vmul.f32 %v616_v51, %v3681_v54  ;;  %v654_v34 = vmul.f32 %v616_v51, %v3685_v28  ;;  %v3725_v62 = vrot.slane %v3693_v57, %v3091_v13 }
  0x62   :  { %v1271_v46 = vadd.f32 %v1255_v18, %v1183_v14  ;;  %v1272_v21 = vadd.f32 %v1256_v20, %v1184_v15  ;;  %v563_v23 = vmul.f32 %v3600_v58, %v543_v63  ;;  %2770 = vmatpush3.bf16.msra.mxu1 %v2926_v36  ;;  %2756 = vmatpush3.bf16.msra.mxu0 %v2927_v25  ;;  %v3758_v36 = vld.sshfl [vmem:[%s4209_s1 + $0x8] sm:$0x33 pattern:$0x75316420] }
  0x63   :  { %v3730_v47 = vrot.slane %v3706_v3, %v3091_v13  ;;  %v564_v45 = vmul.f32 %v3605_v43, %v544_v61  ;;  %v673_v27 = vmul.f32 %v3698_v42, %v653_v50  ;;  %v674_v7 = vmul.f32 %v3715_v8, %v654_v34  ;;  %2771 = vmatprep.subr.bf16.mxu1 %v3041_v0 }
  0x64   :  { %2757 = vmatprep.subr.bf16.mxu0 %v3041_v0  ;;  %v2592_v53 = vpack.c.bf16 %v1272_v21, %v1271_v46  ;;  %v858_v58 = vrot.slane %v3725_v62, %v3099_v19  ;;  %v1121_v43 = vcombine.high %v3492_v29, %v3492_v29  ;;  %v1138_v32 = vrot.slane %v1069_v26, %v3099_v19 }
  0x65   :  { %v939_v41 = vrot.slane %v3730_v47, %v3099_v19  ;;  %v3741_v14 = vadd.f32 %v673_v27, %v563_v23  ;;  %v3743_v15 = vadd.f32 %v674_v7, %v564_v45  ;;  %v3772_v61 = vrot.slane %v3758_v36, %v3091_v13  ;;  %v2934_v27 = vld [vmem:[#allocation3 + $0xd0] sm:$0xff]   ;;  %v2937_v7 = vld [vmem:[#allocation3 + $0x138] sm:$0xff]  }
  0x66   :  { %2620 = vst [vmem:[#allocation2 + $0x18] sm:$0xff] %v2592_v53   ;;  %v892_v40 = vmul.f32 %v858_v58, %v3541_v56  ;;  %v893_v10 = vmul.f32 %v858_v58, %v3547_v4  ;;  %2772 = vmatpush3.bf16.msra.mxu1 %v2928_v35  ;;  %2758 = vmatpush3.bf16.msra.mxu0 %v2929_v31  ;;  %v2935_v31 = vld [vmem:[#allocation2 + $0x10] sm:$0xff]  }
  0x67   :  { %v973_v11 = vmul.f32 %v939_v41, %v3681_v54  ;;  %v974_v48 = vmul.f32 %v939_v41, %v3685_v28  ;;  %v1169_v12 = vmul.f32 %v1138_v32, %v3276_v16  ;;  %v1170_v24 = vmul.f32 %v1138_v32, %v3280_v17  ;;  %2773 = vmatprep.subr.bf16.mxu1 %v3041_v0 }
  0x68   :  { %v1210_v29 = vrot.slane %v1121_v43, %v3099_v19  ;;  %2759 = vmatprep.subr.bf16.mxu0 %v3041_v0  ;;  %v910_v25 = vmul.f32 %v892_v40, %v3632_v33  ;;  %v911_v51 = vmul.f32 %v893_v10, %v3634_v39  ;;  %v3777_v33 = vld [vmem:[%s4208_s0] sm:$0xff]  ;;  %v3797_v34 = vrot.slane %v3772_v61, %v3099_v19 }
  0x69   :  { %v991_v52 = vmul.f32 %v973_v11, %v3741_v14  ;;  %v992_v16 = vmul.f32 %v974_v48, %v3743_v15  ;;  %v1185_v17 = vmul.f32 %v1169_v12, %v1007_v6  ;;  %v1186_v26 = vmul.f32 %v1170_v24, %v1008_v38  ;;  %v2932_v39 = vld [vmem:[#allocation3 + $0xd8] sm:$0xff]  }
  0x6a   :  { %v1241_v18 = vmul.f32 %v1210_v29, %v3681_v54  ;;  %v1242_v63 = vmul.f32 %v1210_v29, %v3685_v28  ;;  %vm212_vm11 = vcmp.ge.f32.partialorder %v3777_v33, %v3185_v60  ;;  %2774 = vmatpush3.bf16.msra.mxu1 %v2930_v1  ;;  %2760 = vmatpush3.bf16.msra.mxu0 %v2931_v9  ;;  %v2933_v54 = vld [vmem:[#allocation3 + $0x80] sm:$0xff]  }
  0x6b   :  { %v3767_v20 = vadd.f32 %v991_v52, %v910_v25  ;;  %v3781_v6 = vadd.f32 %v992_v16, %v911_v51  ;;  %v3786_v28 = vld [vmem:[%s4208_s0 + $0x8] sm:$0xff]  ;;  %v363_v38 = vcombine.high %v3531_v22, %v3531_v22  ;;  %2775 = vmatprep.subr.bf16.mxu1 %v3041_v0  ;;  %2761 = vmatprep.subr.bf16.mxu0 %v3041_v0  ;;  %v2939_v25 = vld [vmem:[#allocation3 + $0x130] sm:$0xff]  }
  0x6c   :  { %vm213_vm12 = vcmp.ge.f32.partialorder %v3786_v28, %v3185_v60  ;;  %v438_v46 = vcombine.high %v3564_v37, %v3564_v37  ;;  %v3804_v23 = vsub.f32 %v3777_v33, %v3179_v59  ;;  %v3808_v22 = vsub.f32 %v3786_v28, %v3179_v59 }
  0x6d   :  { %v1257_v50 = vmul.f32 %v1241_v18, %v3767_v20  ;;  %v1258_v21 = vmul.f32 %v1242_v63, %v3781_v6  ;;  %v510_v35 = vrot.slane %v363_v38, %v3099_v19  ;;  %vm239_vm13 = vcmp.lt.f32.partialorder %v3777_v33, %v3797_v34  ;;  %v2938_v38 = vld [vmem:[#allocation3 + $0xc0] sm:$0xff]  }
  0x6e   :  { %vm240_vm14 = vcmp.lt.f32.partialorder %v3786_v28, %v3797_v34  ;;  %v3817_v37 = vsub.f32 %v3797_v34, %v3777_v33  ;;  %2776 = vmatpush3.bf16.msra.mxu1 %v2932_v39  ;;  %2762 = vmatpush3.bf16.msra.mxu0 %v2933_v54  ;;  %vm261_vm15 = vmand %vm212_vm11, %vm239_vm13  ;;  %v586_v43 = vsub.f32 %v3797_v34, %v3786_v28 }
  0x6f   :  { %v1273_v45 = vadd.f32 %v1257_v50, %v1185_v17  ;;  %v1274_v59 = vadd.f32 %v1258_v21, %v1186_v26  ;;  %v545_v53 = vmul.f32 %v510_v35, %v3804_v23  ;;  %v546_v58 = vmul.f32 %v510_v35, %v3808_v22  ;;  %2777 = vmatprep.subr.bf16.mxu1 %v3041_v0  ;;  %vm262_vm1 = vmand %vm213_vm12, %vm240_vm14  ;;  %v2941_v50 = vld [vmem:[#allocation3 + $0x128] sm:$0xff]  }
  0x70   :  { %2787 = vmatprep.subr.bf16.mxu0 %v3041_v0  ;;  %v3830_v41 = vsel %vm261_vm15, 1.0, %v3041_v0  ;;  %v620_v32 = vrot.slane %v438_v46, %v3099_v19  ;;  %v724_v40 = vcombine.high %v3693_v57, %v3693_v57  ;;  %v3838_v11 = vsel %vm262_vm1, 1.0, %v3041_v0  ;;  %v2936_v57 = vld [vmem:[#allocation3 + $0xc8] sm:$0xff]  }
  0x71   :  { %v2597_v10 = vpack.c.bf16 %v1274_v59, %v1273_v45  ;;  %v565_v48 = vmul.f32 %v3698_v42, %v545_v53  ;;  %v566_v1 = vmul.f32 %v3715_v8, %v546_v58  ;;  %2764 = vmatmul.mubr.bf16.vlgmr.msra.gmra.mxu0 %v2935_v31  ;;  %v792_v29 = vcombine.high %v3706_v3, %v3706_v3 }
  0x72   :  { %v655_v9 = vmul.f32 %v620_v32, %v3817_v37  ;;  %v656_v12 = vmul.f32 %v620_v32, %v586_v43  ;;  %v3844_v24 = vrot.slane %v724_v40, %v3091_v13  ;;  %2778 = vmatpush3.bf16.msra.mxu1 %v2934_v27  ;;  %2788 = vmatpush3.bf16.msra.mxu0 %v2937_v7  ;;  %v2940_v32 = vld [vmem:[#allocation2 + $0x18] sm:$0xff]  }
  0x73   :  { %2621 = vst [vmem:[#allocation2 + $0x20] sm:$0xff] %v2597_v10   ;;  %v4236_v42 = vcombine.high %v3373_v2, %v3373_v2  ;;  %v4237_v51 = vcombine.high %v3394_v30, %v3394_v30  ;;  %v126_v3 = vcombine.high %v3758_v36, %v3758_v36  ;;  %2779 = vmatprep.subr.bf16.mxu1 %v3041_v0 }
  0x74   :  { %2789 = vmatprep.subr.bf16.mxu0 %v3041_v0  ;;  %v675_v16 = vmul.f32 %v3830_v41, %v655_v9  ;;  %v676_v17 = vmul.f32 %v3838_v11, %v656_v12  ;;  %v3867_v2 = vrot.slane %v792_v29, %v3091_v13  ;;  %2803 = vmatprep.mubr.msk.bf16.mxu0 %vm4229_vm5, %v3041_v0  ;;  %v2942_v9 = vld [vmem:[#allocation3 + $0x178] sm:$0xff]   ;;  %v2943_v12 = vld [vmem:[#allocation3 + $0x120] sm:$0xff]  }
  0x75   :  { %v3852_v8 = vrot.slane %v4236_v42, %v3091_v13  ;;  %v3858_v52 = vrot.slane %v4237_v51, %v3091_v13  ;;  %v862_v30 = vrot.slane %v3844_v24, %v3099_v19  ;;  %v3882_v18 = vrot.slane %v126_v3, %v3091_v13 }
  0x76   :  { %v3884_v63 = vadd.f32 %v675_v16, %v565_v48  ;;  %v3886_v39 = vadd.f32 %v676_v17, %v566_v1  ;;  %v943_v54 = vrot.slane %v3867_v2, %v3099_v19  ;;  %vm214_vm2 = vcmp.ge.f32.partialorder %v3777_v33, %v3797_v34  ;;  %2780 = vmatpush3.bf16.msra.mxu1 %v2936_v57 }
  0x77   :  { %v3875_v36 = vrot.slane %v3852_v8, %v3091_v13  ;;  %v3879_v26 = vrot.slane %v3858_v52, %v3091_v13  ;;  %2790 = vmatpush3.bf16.msra.mxu0 %v2939_v25  ;;  %v894_v46 = vmul.f32 %v862_v30, %v3660_v49  ;;  %v895_v21 = vmul.f32 %v862_v30, %v3677_v55 }
  0x78   :  { %2781 = vmatprep.subr.bf16.mxu1 %v3041_v0  ;;  %2791 = vmatprep.subr.bf16.mxu0 %v3041_v0  ;;  %v975_v31 = vmul.f32 %v943_v54, %v3817_v37  ;;  %v976_v45 = vmul.f32 %v943_v54, %v586_v43  ;;  %vm215_vm3 = vcmp.ge.f32.partialorder %v3786_v28, %v3797_v34 }
  0x79   :  { %v1142_v35 = vrot.slane %v3875_v36, %v3099_v19  ;;  %v1214_v27 = vrot.slane %v3879_v26, %v3099_v19  ;;  %v912_v7 = vmul.f32 %v894_v46, %v3741_v14  ;;  %v913_v59 = vmul.f32 %v895_v21, %v3743_v15 }
  0x7a   :  { %v993_v40 = vmul.f32 %v975_v31, %v3884_v63  ;;  %v994_v10 = vmul.f32 %v976_v45, %v3886_v39  ;;  %2782 = vmatpush3.bf16.msra.mxu1 %v2938_v38  ;;  %v3937_v57 = vsub.f32 %v3777_v33, %v3185_v60  ;;  %v3941_v25 = vsub.f32 %v3786_v28, %v3185_v60 }
  0x7b   :  { %v1171_v53 = vmul.f32 %v1142_v35, %v3541_v56  ;;  %v1172_v58 = vmul.f32 %v1142_v35, %v3547_v4  ;;  %v1243_v48 = vmul.f32 %v1214_v27, %v3817_v37  ;;  %v1244_v1 = vmul.f32 %v1214_v27, %v586_v43  ;;  %2792 = vmatpush3.bf16.msra.mxu0 %v2941_v50 }
  0x7c   :  { %v3912_v56 = vrot.slane %v3882_v18, %v3099_v19  ;;  %2807 = vmatprep.subr.bf16.mxu1 %v3041_v0  ;;  %2793 = vmatprep.subr.bf16.mxu0 %v3041_v0  ;;  %v3916_v4 = vadd.f32 %v993_v40, %v912_v7  ;;  %v3918_v37 = vadd.f32 %v994_v10, %v913_v59  ;;  %v2946_v7 = vld [vmem:[#allocation3 + $0x168] sm:$0xff]   ;;  %v2947_v59 = vld [vmem:[#allocation3 + $0x110] sm:$0xff]  }
  0x7d   :  { %v1187_v14 = vmul.f32 %v1171_v53, %v3767_v20  ;;  %v1188_v15 = vmul.f32 %v1172_v58, %v3781_v6  ;;  %v365_v20 = vcombine.high %v3656_v44, %v3656_v44  ;;  %v440_v6 = vcombine.high %v3673_v5, %v3673_v5  ;;  %2784 = vmatmul.mubr.bf16.vlgmr.msra.gmra.mxu1 %v2940_v32  ;;  %v2944_v44 = vld [vmem:[#allocation3 + $0x170] sm:$0xff]   ;;  %v2945_v5 = vld [vmem:[#allocation3 + $0x118] sm:$0xff]  }
  0x7e   :  { %vm241_vm4 = vcmp.lt.f32.partialorder %v3777_v33, %v3912_v56  ;;  %vm242_vm6 = vcmp.lt.f32.partialorder %v3786_v28, %v3912_v56  ;;  %v1259_v43 = vmul.f32 %v1243_v48, %v3916_v4  ;;  %v1260_v29 = vmul.f32 %v1244_v1, %v3918_v37  ;;  %2808 = vmatpush3.bf16.msra.mxu1 %v2942_v9 }
  0x7f   :  { %vm263_vm0 = vmand %vm214_vm2, %vm241_vm4  ;;  %2794 = vmatpush3.bf16.msra.mxu0 %v2943_v12  ;;  %v514_v51 = vrot.slane %v365_v20, %v3099_v19  ;;  %v3952_v3 = vsub.f32 %v3912_v56, %v3777_v33  ;;  %v3956_v60 = vsub.f32 %v3912_v56, %v3786_v28  ;;  %2809 = vmatprep.subr.bf16.mxu1 %v3041_v0 }
  0x80   :  { %vm264_vm8 = vmand %vm215_vm3, %vm242_vm6  ;;  %v3947_v42 = vsel %vm263_vm0, 1.0, %v3041_v0  ;;  %2795 = vmatprep.subr.bf16.mxu0 %v3041_v0  ;;  %v1275_v16 = vadd.f32 %v1259_v43, %v1187_v14  ;;  %v1276_v17 = vadd.f32 %v1260_v29, %v1188_v15  ;;  %v624_v54 = vrot.slane %v440_v6, %v3099_v19  ;;  %2823 = vmatprep.mubr.msk.bf16.mxu1 %vm4229_vm5, %v3041_v0  ;;  %v2948_v14 = vld [vmem:[#allocation3 + $0x160] sm:$0xff]   ;;  %v2949_v15 = vld [vmem:[#allocation3 + $0x108] sm:$0xff]  }
  0x81   :  { %v3961_v30 = vsel %vm264_vm8, 1.0, %v3041_v0  ;;  %v547_v38 = vmul.f32 %v514_v51, %v3937_v57  ;;  %v548_v50 = vmul.f32 %v514_v51, %v3941_v25  ;;  %v754_v46 = vcombine.high %v3725_v62, %v3725_v62  ;;  %v2950_v51 = vld [vmem:[#allocation3 + $0x158] sm:$0xff]  }
  0x82   :  { %v822_v21 = vcombine.high %v3730_v47, %v3730_v47  ;;  %v2602_v35 = vpack.c.bf16 %v1276_v17, %v1275_v16  ;;  %v657_v31 = vmul.f32 %v624_v54, %v3952_v3  ;;  %v658_v45 = vmul.f32 %v624_v54, %v3956_v60  ;;  %2810 = vmatpush3.bf16.msra.mxu1 %v2944_v44 }
  0x83   :  { %v1038_v27 = vcombine.high %v3852_v8, %v3852_v8  ;;  %2796 = vmatpush3.bf16.msra.mxu0 %v2945_v5  ;;  %v567_v53 = vmul.f32 %v3830_v41, %v547_v38  ;;  %v568_v58 = vmul.f32 %v3838_v11, %v548_v50  ;;  %v866_v62 = vrot.slane %v754_v46, %v3099_v19  ;;  %v4030_v38 = vld.sshfl [vmem:[%s4211_s3 + $0x8] sm:$0x11 pattern:$0x75316420] }
  0x84   :  { %2811 = vmatprep.subr.bf16.mxu1 %v3041_v0  ;;  %2797 = vmatprep.subr.bf16.mxu0 %v3041_v0  ;;  %2622 = vst [vmem:[#allocation2 + $0x28] sm:$0xff] %v2602_v35   ;;  %v677_v47 = vmul.f32 %v3947_v42, %v657_v31  ;;  %v678_v32 = vmul.f32 %v3961_v30, %v658_v45  ;;  %v2951_v50 = vld [vmem:[#allocation3 + $0x100] sm:$0xff]  }
  0x85   :  { %v947_v8 = vrot.slane %v822_v21, %v3099_v19  ;;  %v896_v40 = vmul.f32 %v866_v62, %v3804_v23  ;;  %v897_v10 = vmul.f32 %v866_v62, %v3808_v22  ;;  %v3987_v41 = vrot.slane %v1038_v27, %v3091_v13 }
  0x86   :  { %v1090_v11 = vcombine.high %v3858_v52, %v3858_v52  ;;  %v3991_v48 = vadd.f32 %v677_v47, %v567_v53  ;;  %v3993_v1 = vadd.f32 %v678_v32, %v568_v58  ;;  %2812 = vmatpush3.bf16.msra.mxu1 %v2946_v7  ;;  %vm216_vm7 = vcmp.ge.f32.partialorder %v3777_v33, %v3912_v56  ;;  %v2955_v53 = vld [vmem:[#allocation3 + $0x1b8] sm:$0xff]  }
  0x87   :  { %v977_v9 = vmul.f32 %v947_v8, %v3952_v3  ;;  %v978_v12 = vmul.f32 %v947_v8, %v3956_v60  ;;  %2798 = vmatpush3.bf16.msra.mxu0 %v2947_v59  ;;  %v914_v20 = vmul.f32 %v896_v40, %v3884_v63  ;;  %v915_v6 = vmul.f32 %v897_v10, %v3886_v39  ;;  %v4019_v39 = vld.sshfl [vmem:[%s4210_s2 + $0x8] sm:$0x11 pattern:$0x75316420]  ;;  %v2952_v59 = vld [vmem:[#allocation3 + $0x150] sm:$0xff]  }
  0x88   :  { %v4000_v43 = vrot.slane %v1090_v11, %v3091_v13  ;;  %2813 = vmatprep.subr.bf16.mxu1 %v3041_v0  ;;  %2799 = vmatprep.subr.bf16.mxu0 %v3041_v0  ;;  %v1146_v44 = vrot.slane %v3987_v41, %v3099_v19  ;;  %v141_v63 = vcombine.high %v3772_v61, %v3772_v61 }
  0x89   :  { %v995_v52 = vmul.f32 %v977_v9, %v3991_v48  ;;  %v996_v29 = vmul.f32 %v978_v12, %v3993_v1  ;;  %vm217_vm9 = vcmp.ge.f32.partialorder %v3786_v28, %v3912_v56  ;;  %v380_v31 = vrot.slane %v4019_v39, %v3091_v13 }
  0x8a   :  { %v1218_v5 = vrot.slane %v4000_v43, %v3099_v19  ;;  %v1173_v54 = vmul.f32 %v1146_v44, %v3660_v49  ;;  %v1174_v61 = vmul.f32 %v1146_v44, %v3677_v55  ;;  %2814 = vmatpush3.bf16.msra.mxu1 %v2948_v14  ;;  %v4035_v35 = vrot.slane %v141_v63, %v3099_v19  ;;  %v2957_v44 = vld [vmem:[#allocation3 + $0x1b0] sm:$0xff]  }
  0x8b   :  { %v4021_v16 = vadd.f32 %v995_v52, %v914_v20  ;;  %v4023_v17 = vadd.f32 %v996_v29, %v915_v6  ;;  %2800 = vmatpush3.bf16.msra.mxu0 %v2949_v15  ;;  %2815 = vmatprep.subr.bf16.mxu1 %v3041_v0  ;;  %v4060_v27 = vsub.f32 %v3786_v28, %v3797_v34  ;;  %v2954_v29 = vld [vmem:[#allocation3 + $0x148] sm:$0xff]  }
  0x8c   :  { %v1245_v46 = vmul.f32 %v1218_v5, %v3952_v3  ;;  %v1246_v21 = vmul.f32 %v1218_v5, %v3956_v60  ;;  %2801 = vmatprep.subr.bf16.mxu0 %v3041_v0  ;;  %v1189_v49 = vmul.f32 %v1173_v54, %v3916_v4  ;;  %v1190_v55 = vmul.f32 %v1174_v61, %v3918_v37  ;;  %v2953_v60 = vld [vmem:[#allocation2 + $0x20] sm:$0xff]  }
  0x8d   :  { %vm243_vm10 = vcmp.lt.f32.partialorder %v3777_v33, %v4035_v35  ;;  %vm244_vm11 = vcmp.lt.f32.partialorder %v3786_v28, %v4035_v35  ;;  %v455_v4 = vrot.slane %v4030_v38, %v3091_v13  ;;  %v4056_v37 = vsub.f32 %v3777_v33, %v3797_v34 }
  0x8e   :  { %v1261_v45 = vmul.f32 %v1245_v46, %v4021_v16  ;;  %v1262_v3 = vmul.f32 %v1246_v21, %v4023_v17  ;;  %vm265_vm12 = vmand %vm216_vm7, %vm243_vm10  ;;  %v518_v7 = vrot.slane %v380_v31, %v3099_v19  ;;  %2816 = vmatpush3.bf16.msra.mxu1 %v2950_v51  ;;  %v589_v32 = vsub.f32 %v4035_v35, %v3777_v33 }
  0x8f   :  { %2802 = vmatpush3.bf16.msra.mxu0 %v2951_v50  ;;  %vm266_vm13 = vmand %vm217_vm9, %vm244_vm11  ;;  %v4067_v47 = vsel %vm265_vm12, 1.0, %v3041_v0  ;;  %2817 = vmatprep.subr.bf16.mxu1 %v3041_v0  ;;  %v590_v10 = vsub.f32 %v4035_v35, %v3786_v28  ;;  %v628_v9 = vrot.slane %v455_v4, %v3099_v19  ;;  %v756_v12 = vcombine.high %v3844_v24, %v3844_v24 }
  0x90   :  { %v1277_v58 = vadd.f32 %v1261_v45, %v1189_v49  ;;  %v1278_v62 = vadd.f32 %v1262_v3, %v1190_v55  ;;  %2827 = vmatprep.subr.bf16.mxu0 %v3041_v0  ;;  %v4074_v34 = vsel %vm266_vm13, 1.0, %v3041_v0  ;;  %v549_v8 = vmul.f32 %v518_v7, %v4056_v37  ;;  %v2956_v49 = vld [vmem:[#allocation3 + $0x140] sm:$0xff]   ;;  %v2959_v55 = vld [vmem:[#allocation3 + $0x1a8] sm:$0xff]  }
  0x91   :  { %v550_v40 = vmul.f32 %v518_v7, %v4060_v27  ;;  %v824_v14 = vcombine.high %v3867_v2, %v3867_v2  ;;  %v1068_v6 = vcombine.high %v3875_v36, %v3875_v36  ;;  %v1120_v52 = vcombine.high %v3879_v26, %v3879_v26 }
  0x92   :  { %v2607_v11 = vpack.c.bf16 %v1278_v62, %v1277_v58  ;;  %2804 = vmatmul.mubr.bf16.vlgmr.msra.gmra.mxu0 %v2953_v60  ;;  %v569_v15 = vmul.f32 %v3947_v42, %v549_v8  ;;  %2818 = vmatpush3.bf16.msra.mxu1 %v2952_v59  ;;  %v659_v24 = vmul.f32 %v628_v9, %v589_v32  ;;  %v2958_v58 = vld [vmem:[#allocation2 + $0x28] sm:$0xff]  }
  0x93   :  { %v570_v20 = vmul.f32 %v3961_v30, %v550_v40  ;;  %2828 = vmatpush3.bf16.msra.mxu0 %v2955_v53  ;;  %v660_v5 = vmul.f32 %v628_v9, %v590_v10  ;;  %v870_v2 = vrot.slane %v756_v12, %v3099_v19  ;;  %2819 = vmatprep.subr.bf16.mxu1 %v3041_v0  ;;  %v2453_v12 = vld.sshfl [vmem:[%s4210_s2 + $0x18] sm:$0x1 pattern:$0x75316420]  ;;  %s3044_s2 = smov [#allocation6]  }
  0x94   :  { %2623 = vst [vmem:[#allocation2 + $0x30] sm:$0xff] %v2607_v11   ;;  %2829 = vmatprep.subr.bf16.mxu0 %v3041_v0  ;;  %v951_v42 = vrot.slane %v824_v14, %v3099_v19  ;;  %v1150_v36 = vrot.slane %v1068_v6, %v3099_v19  ;;  %v1222_v30 = vrot.slane %v1120_v52, %v3099_v19  ;;  %v2963_v6 = vld [vmem:[#allocation3 + $0x198] sm:$0xff]  }
  0x95   :  { %2843 = vmatprep.mubr.msk.bf16.mxu0 %vm4229_vm5, %v3041_v0  ;;  %v679_v26 = vmul.f32 %v4067_v47, %v659_v24  ;;  %v680_v63 = vmul.f32 %v4074_v34, %v660_v5  ;;  %v898_v51 = vmul.f32 %v870_v2, %v3937_v57  ;;  %v899_v54 = vmul.f32 %v870_v2, %v3941_v25 }
  0x96   :  { %v979_v61 = vmul.f32 %v951_v42, %v589_v32  ;;  %v980_v50 = vmul.f32 %v951_v42, %v590_v10  ;;  %v1175_v46 = vmul.f32 %v1150_v36, %v3804_v23  ;;  %v1176_v21 = vmul.f32 %v1150_v36, %v3808_v22  ;;  %2820 = vmatpush3.bf16.msra.mxu1 %v2954_v29 }
  0x97   :  { %2830 = vmatpush3.bf16.msra.mxu0 %v2957_v44  ;;  %v4105_v31 = vadd.f32 %v679_v26, %v569_v15  ;;  %v4107_v45 = vadd.f32 %v680_v63, %v570_v20  ;;  %v916_v3 = vmul.f32 %v898_v51, %v3991_v48  ;;  %2821 = vmatprep.subr.bf16.mxu1 %v3041_v0  ;;  %v2456_v20 = vld.sshfl [vmem:[%s4211_s3 + $0x18] sm:$0x1 pattern:$0x75316420]  ;;  %s2410_s3 = sshll.u32 %s3044_s2, 4  ;;  %s2411_s3 = int_to_ptr.vmem [resolvable:$true] %s2410_s3 }
  0x98   :  { %2831 = vmatprep.subr.bf16.mxu0 %v3041_v0  ;;  %v917_v60 = vmul.f32 %v899_v54, %v3993_v1  ;;  %v1191_v23 = vmul.f32 %v1175_v46, %v4021_v16  ;;  %v1192_v22 = vmul.f32 %v1176_v21, %v4023_v17  ;;  %v1247_v59 = vmul.f32 %v1222_v30, %v589_v32  ;;  %v2960_v16 = vld [vmem:[#allocation3 + $0x1f8] sm:$0xff]   ;;  %v2961_v17 = vld [vmem:[#allocation3 + $0x1a0] sm:$0xff]   ;;  %v2964_v54 = vld [vmem:[#allocation3 + $0x1e8] sm:$0xff]   ;;  %s3014_s28 = scalar_lea.vmem %s2411_s3, 256  ;;  %p3019_p6 = scmp.lt.s32.totalorder %s2411_s3, %s2411_s3 }
  0x99   :  { %v997_v4 = vmul.f32 %v979_v61, %v4105_v31  ;;  %v998_v7 = vmul.f32 %v980_v50, %v4107_v45  ;;  %v1248_v53 = vmul.f32 %v1222_v30, %v590_v10  ;;  %v142_v48 = vcombine.high %v3882_v18, %v3882_v18  ;;  %v2965_v61 = vld [vmem:[#allocation3 + $0x190] sm:$0xff]   ;;  %p3015_p5 = scmp.ne.s32.totalorder %s2411_s3, %s3014_s28  ;;  %p3020_p7 = scmp.lt.s32.totalorder %s3014_s28, %s3014_s28 }
  0x9a   :  { %vm218_vm14 = vcmp.ge.f32.partialorder %v3777_v33, %v4035_v35  ;;  %vm219_vm15 = vcmp.ge.f32.partialorder %v3786_v28, %v4035_v35  ;;  %v373_v1 = vcombine.high %v4019_v39, %v4019_v39  ;;  %2822 = vmatpush3.bf16.msra.mxu1 %v2956_v49  ;;  %v448_v18 = vcombine.high %v4030_v38, %v4030_v38 }
  0x9b   :  { %2832 = vmatpush3.bf16.msra.mxu0 %v2959_v55  ;;  %v4125_v62 = vadd.f32 %v997_v4, %v916_v3  ;;  %v4127_v32 = vadd.f32 %v998_v7, %v917_v60  ;;  %2847 = vmatprep.subr.bf16.mxu1 %v3041_v0  ;;  %v223_v8 = vrot.slane %v142_v48, %v3099_v19  ;;  %v2966_v7 = vld [vmem:[#allocation3 + $0x1e0] sm:$0xff]   ;;  %p3021_p8 = por %p3020_p7, %p3019_p6 }
  0x9c   :  { %2833 = vmatprep.subr.bf16.mxu0 %v3041_v0  ;;  %v387_v40 = vrot.slane %v373_v1, %v3091_v13  ;;  %v481_v39 = vsub.f32 %v3777_v33, %v3912_v56  ;;  %v462_v9 = vrot.slane %v448_v18, %v3091_v13  ;;  %v482_v38 = vsub.f32 %v3786_v28, %v3912_v56  ;;  %v2962_v56 = vld [vmem:[#allocation3 + $0x1f0] sm:$0xff]  }
  0x9d   :  { %v1263_v10 = vmul.f32 %v1247_v59, %v4125_v62  ;;  %v1264_v11 = vmul.f32 %v1248_v53, %v4127_v32  ;;  %2824 = vmatmul.mubr.bf16.vlgmr.msra.gmra.mxu1 %v2958_v58  ;;  %vm245_vm1 = vcmp.lt.f32.partialorder %v3777_v33, %v223_v8  ;;  %vm246_vm2 = vcmp.lt.f32.partialorder %v3786_v28, %v223_v8  ;;  %v2967_v59 = vld [vmem:[#allocation3 + $0x188] sm:$0xff]   ;;  %p3022_p9 = pnand %p3021_p8, %p3015_p5 }
  0x9e   :  { %v522_v14 = vrot.slane %v387_v40, %v3099_v19  ;;  %v591_v15 = vsub.f32 %v223_v8, %v3777_v33  ;;  %2848 = vmatpush3.bf16.msra.mxu1 %v2960_v16  ;;  %vm267_vm3 = vmand %vm218_vm14, %vm245_vm1  ;;  %v592_v44 = vsub.f32 %v223_v8, %v3786_v28  ;;  %v632_v42 = vrot.slane %v462_v9, %v3099_v19  ;;  %v2973_v9 = vld [vmem:[#allocation3 + $0x238] sm:$0xff]  }
  0x9f   :  { %2834 = vmatpush3.bf16.msra.mxu0 %v2961_v17  ;;  %v1279_v52 = vadd.f32 %v1263_v10, %v1191_v23  ;;  %v1280_v29 = vadd.f32 %v1264_v11, %v1192_v22  ;;  %2849 = vmatprep.subr.bf16.mxu1 %v3041_v0  ;;  %vm268_vm4 = vmand %vm219_vm15, %vm246_vm2  ;;  %v2447_v24 = vsel %vm267_vm3, 1.0, %v3041_v0  ;;  %v770_v30 = vrot.slane %v2453_v12, %v3091_v13  ;;  %v2970_v11 = vld [vmem:[#allocation3 + $0x1d0] sm:$0xff]   ;;  %v2974_v12 = vld [vmem:[#allocation3 + $0x1c0] sm:$0xff]  }
  0xa0   :  { %2835 = vmatprep.subr.bf16.mxu0 %v3041_v0  ;;  %v551_v5 = vmul.f32 %v522_v14, %v481_v39  ;;  %v552_v2 = vmul.f32 %v522_v14, %v482_v38  ;;  %2863 = vmatprep.mubr.msk.bf16.mxu1 %vm4229_vm5, %v3041_v0  ;;  %v2448_v36 = vsel %vm268_vm4, 1.0, %v3041_v0  ;;  %v838_v26 = vrot.slane %v2456_v20, %v3091_v13  ;;  %v2971_v39 = vld [vmem:[#allocation2 + $0x30] sm:$0xff]   ;;  %v2975_v38 = vld [vmem:[#allocation3 + $0x230] sm:$0xff]   ;;  %v2978_v20 = vld [vmem:[#allocation3 + $0x220] sm:$0xff]  }
  0xa1   :  { %v2612_v33 = vpack.c.bf16 %v1280_v29, %v1279_v52  ;;  %v661_v35 = vmul.f32 %v632_v42, %v591_v15  ;;  %v662_v51 = vmul.f32 %v632_v42, %v592_v44  ;;  %v874_v50 = vrot.slane %v770_v30, %v3099_v19  ;;  %v2977_v14 = vld [vmem:[#allocation3 + $0x228] sm:$0xff]   ;;  %v2982_v29 = vld [vmem:[#allocation3 + $0x200] sm:$0xff]  }
  0xa2   :  { %v571_v63 = vmul.f32 %v4067_v47, %v551_v5  ;;  %v572_v28 = vmul.f32 %v4074_v34, %v552_v2  ;;  %2850 = vmatpush3.bf16.msra.mxu1 %v2962_v56  ;;  %v955_v46 = vrot.slane %v838_v26, %v3099_v19  ;;  %v1070_v21 = vcombine.high %v3987_v41, %v3987_v41  ;;  %v2979_v56 = vld [vmem:[#allocation3 + $0x218] sm:$0xff]   ;;  %v2981_v52 = vld [vmem:[#allocation3 + $0x208] sm:$0xff]  }
  0xa3   :  { %2836 = vmatpush3.bf16.msra.mxu0 %v2963_v6  ;;  %2624 = vst [vmem:[#allocation2 + $0x38] sm:$0xff] %v2612_v33   ;;  %2851 = vmatprep.subr.bf16.mxu1 %v3041_v0  ;;  %v681_v13 = vmul.f32 %v2447_v24, %v661_v35  ;;  %v682_v47 = vmul.f32 %v2448_v36, %v662_v51  ;;  %v2980_v6 = vld [vmem:[#allocation3 + $0x210] sm:$0xff]  }
  0xa4   :  { %2837 = vmatprep.subr.bf16.mxu0 %v3041_v0  ;;  %v1122_v34 = vcombine.high %v4000_v43, %v4000_v43  ;;  %v900_v49 = vmul.f32 %v874_v50, %v4056_v37  ;;  %v901_v55 = vmul.f32 %v874_v50, %v4060_v27  ;;  %v981_v3 = vmul.f32 %v955_v46, %v591_v15 }
  0xa5   :  { %v982_v60 = vmul.f32 %v955_v46, %v592_v44  ;;  %v701_v23 = vadd.f32 %v681_v13, %v571_v63  ;;  %v702_v22 = vadd.f32 %v682_v47, %v572_v28  ;;  %v1154_v4 = vrot.slane %v1070_v21, %v3099_v19 }
  0xa6   :  { %v1226_v41 = vrot.slane %v1122_v34, %v3099_v19  ;;  %2852 = vmatpush3.bf16.msra.mxu1 %v2964_v54  ;;  %v918_v53 = vmul.f32 %v900_v49, %v4105_v31  ;;  %v919_v43 = vmul.f32 %v901_v55, %v4107_v45  ;;  %v2968_v31 = vld [vmem:[#allocation3 + $0x1d8] sm:$0xff]   ;;  %v2969_v45 = vld [vmem:[#allocation3 + $0x180] sm:$0xff]  }
  0xa7   :  { %2838 = vmatpush3.bf16.msra.mxu0 %v2965_v61  ;;  %2853 = vmatprep.subr.bf16.mxu1 %v3041_v0  ;;  %v999_v37 = vmul.f32 %v981_v3, %v701_v23  ;;  %v1000_v27 = vmul.f32 %v982_v60, %v702_v22  ;;  %v1177_v58 = vmul.f32 %v1154_v4, %v3937_v57 }
  0xa8   :  { %2839 = vmatprep.subr.bf16.mxu0 %v3041_v0  ;;  %v1178_v48 = vmul.f32 %v1154_v4, %v3941_v25  ;;  %v1249_v1 = vmul.f32 %v1226_v41, %v591_v15  ;;  %v1250_v19 = vmul.f32 %v1226_v41, %v592_v44 }
  0xa9   :  { %v1017_v16 = vadd.f32 %v999_v37, %v918_v53  ;;  %v1018_v17 = vadd.f32 %v1000_v27, %v919_v43  ;;  %v1193_v18 = vmul.f32 %v1177_v58, %v4125_v62 }
  0xaa   :  { %2854 = vmatpush3.bf16.msra.mxu1 %v2966_v7  ;;  %v1194_v8 = vmul.f32 %v1178_v48, %v4127_v32  ;;  %v2972_v32 = vld [vmem:[#allocation3 + $0x1c8] sm:$0xff]   ;;  %v2976_v15 = vld [vmem:[#allocation2 + $0x38] sm:$0xff]  }
  0xab   :  { %2840 = vmatpush3.bf16.msra.mxu0 %v2967_v59  ;;  %2855 = vmatprep.subr.bf16.mxu1 %v3041_v0  ;;  %v1265_v40 = vmul.f32 %v1249_v1, %v1017_v16  ;;  %v1266_v57 = vmul.f32 %v1250_v19, %v1018_v17 }
  0xac   :  { %2841 = vmatprep.subr.bf16.mxu0 %v3041_v0 }
  0xad   :  { %v1281_v25 = vadd.f32 %v1265_v40, %v1193_v18  ;;  %v1282_v10 = vadd.f32 %v1266_v57, %v1194_v8 }
  0xae   :  { %2856 = vmatpush3.bf16.msra.mxu1 %v2968_v31 }
  0xaf   :  { %2842 = vmatpush3.bf16.msra.mxu0 %v2969_v45  ;;  %2857 = vmatprep.subr.bf16.mxu1 %v3041_v0  ;;  %v2617_v62 = vpack.c.bf16 %v1282_v10, %v1281_v25 }
  0xb0   :  { %2867 = vmatprep.subr.bf16.mxu0 %v3041_v0 }
  0xb1   :  { %2625 = vst [vmem:[#allocation2 + $0x40] sm:$0xff] %v2617_v62  }
  0xb2   :  { %2844 = vmatmul.mubr.bf16.vlgmr.msra.gmra.mxu0 %v2971_v39  ;;  %2858 = vmatpush3.bf16.msra.mxu1 %v2970_v11 }
  0xb3   :  { %2868 = vmatpush3.bf16.msra.mxu0 %v2973_v9  ;;  %2859 = vmatprep.subr.bf16.mxu1 %v3041_v0 }
  0xb4   :  { %2869 = vmatprep.subr.bf16.mxu0 %v3041_v0  ;;  %2883 = vmatprep.mubr.msk.bf16.mxu0 %vm4229_vm5, %v3041_v0 }
  0xb6   :  { %2860 = vmatpush3.bf16.msra.mxu1 %v2972_v32 }
  0xb7   :  { %2870 = vmatpush3.bf16.msra.mxu0 %v2975_v38  ;;  %2861 = vmatprep.subr.bf16.mxu1 %v3041_v0 }
  0xb8   :  { %2871 = vmatprep.subr.bf16.mxu0 %v3041_v0  ;;  %v2983_v44 = vld [vmem:[#allocation2 + $0x40] sm:$0xff]  }
  0xba   :  { %2862 = vmatpush3.bf16.msra.mxu1 %v2974_v12 }
  0xbb   :  { %2872 = vmatpush3.bf16.msra.mxu0 %v2977_v14 }
  0xbc   :  { %2873 = vmatprep.subr.bf16.mxu0 %v3041_v0 }
  0xbd   :  { %2864 = vmatmul.mubr.bf16.vlgmr.msra.gmra.mxu1 %v2976_v15 }
  0xbf   :  { %2874 = vmatpush3.bf16.msra.mxu0 %v2978_v20 }
  0xc0   :  { %2875 = vmatprep.subr.bf16.mxu0 %v3041_v0 }
  0xc3   :  { %2876 = vmatpush3.bf16.msra.mxu0 %v2979_v56 }
  0xc4   :  { %2877 = vmatprep.subr.bf16.mxu0 %v3041_v0 }
  0xc7   :  { %2878 = vmatpush3.bf16.msra.mxu0 %v2980_v6 }
  0xc8   :  { %2879 = vmatprep.subr.bf16.mxu0 %v3041_v0 }
  0xcb   :  { %2880 = vmatpush3.bf16.msra.mxu0 %v2981_v52 }
  0xcc   :  { %2881 = vmatprep.subr.bf16.mxu0 %v3041_v0 }
  0xcf   :  { %2882 = vmatpush3.bf16.msra.mxu0 %v2982_v29 }
  0xd2   :  { %2884 = vmatmul.mubr.bf16.vlgmr.msra.gmra.mxu0 %v2983_v44 }
 0x110   :  { %v1489_v24 = vpop.f32.mrf.mxu0 }
 0x112   :  { %v2725_v5 = vpop.f32.mrf.mxu0 }
 0x114   :  { %v1492_v2 = vpop.f32.mrf.mxu0 }
 0x116   :  { %v2726_v42 = vpop.f32.mrf.mxu0 }
 0x11d   :  { %v1584_v33 = vpop.f32.mrf.mxu1 }
 0x11e   :  { %v1585_v36 = vadd.f32 %v1584_v33, %v1489_v24 }
 0x11f   :  { %v2745_v30 = vpop.f32.mrf.mxu1 }
 0x121   :  { %v1587_v26 = vpop.f32.mrf.mxu1 }
 0x122   :  { %v1588_v63 = vadd.f32 %v1587_v26, %v1492_v2 }
 0x123   :  { %v2746_v28 = vpop.f32.mrf.mxu1 }
 0x131   :  { %v1698_v35 = vpop.f32.mrf.mxu0 }
 0x132   :  { %v1705_v51 = vadd.f32 %v1698_v35, %v1585_v36 }
 0x133   :  { %v2765_v54 = vpop.f32.mrf.mxu0 }
 0x135   :  { %v1701_v61 = vpop.f32.mrf.mxu0 }
 0x136   :  { %v1706_v50 = vadd.f32 %v1701_v61, %v1588_v63 }
 0x137   :  { %v2766_v46 = vpop.f32.mrf.mxu0 }
 0x13d   :  { %v1814_v0 = vpop.f32.mrf.mxu1 }
 0x13e   :  { %v1821_v21 = vadd.f32 %v1814_v0, %v1705_v51 }
 0x13f   :  { %v2785_v13 = vpop.f32.mrf.mxu1 }
 0x141   :  { %v1817_v47 = vpop.f32.mrf.mxu1 }
 0x142   :  { %v1822_v34 = vadd.f32 %v1817_v47, %v1706_v50 }
 0x143   :  { %v2786_v49 = vpop.f32.mrf.mxu1 }
 0x152   :  { %v1930_v55 = vpop.f32.mrf.mxu0 }
 0x153   :  { %v1937_v19 = vadd.f32 %v1930_v55, %v1821_v21 }
 0x154   :  { %v2805_v3 = vpop.f32.mrf.mxu0 }
 0x156   :  { %v1933_v60 = vpop.f32.mrf.mxu0 }
 0x157   :  { %v1938_v17 = vadd.f32 %v1933_v60, %v1822_v34 }
 0x158   :  { %v2806_v23 = vpop.f32.mrf.mxu0 }
 0x15d   :  { %v2046_v22 = vpop.f32.mrf.mxu1 }
 0x15e   :  { %v2053_v16 = vadd.f32 %v2046_v22, %v1937_v19 }
 0x15f   :  { %v2825_v4 = vpop.f32.mrf.mxu1 }
 0x161   :  { %v2049_v41 = vpop.f32.mrf.mxu1 }
 0x162   :  { %v2054_v31 = vadd.f32 %v2049_v41, %v1938_v17 }
 0x163   :  { %v2826_v7 = vpop.f32.mrf.mxu1 }
 0x172   :  { %v2162_v59 = vpop.f32.mrf.mxu0 }
 0x173   :  { %v2169_v18 = vadd.f32 %v2162_v59, %v2053_v16 }
 0x174   :  { %v2845_v53 = vpop.f32.mrf.mxu0 }
 0x176   :  { %v2165_v43 = vpop.f32.mrf.mxu0 }
 0x177   :  { %v2170_v40 = vadd.f32 %v2165_v43, %v2054_v31 }
 0x178   :  { %v2846_v37 = vpop.f32.mrf.mxu0 }
 0x17d   :  { %v2278_v27 = vpop.f32.mrf.mxu1 }
 0x17e   :  { %v2285_v45 = vadd.f32 %v2278_v27, %v2169_v18 }
 0x17f   :  { %v2865_v58 = vpop.f32.mrf.mxu1 }
 0x181   :  { %v2281_v48 = vpop.f32.mrf.mxu1 }
 0x182   :  { %v2286_v25 = vadd.f32 %v2281_v48, %v2170_v40 }
 0x183   :  { %v2866_v1 = vpop.f32.mrf.mxu1 }
 0x192   :  { %v2394_v8 = vpop.f32.mrf.mxu0 }
 0x193   :  { %v2401_v57 = vadd.f32 %v2394_v8, %v2285_v45 }
 0x194   :  { %v2885_v39 = vpop.f32.mrf.mxu0 }
 0x195   :  { %2403 = vst [vmem:[#allocation6] sm:$0xff] %v2401_v57 }
 0x196   :  { %v2397_v10 = vpop.f32.mrf.mxu0 }
 0x197   :  { %v2402_v11 = vadd.f32 %v2397_v10, %v2286_v25 }
 0x198   :  { %v2886_v9 = vpop.f32.mrf.mxu0 }
 0x199   :  { %2404 = vst [vmem:[#allocation6 + $0x8] sm:$0xff] %v2402_v11 }
 0x19a   :  { %3025 = shalt.err (!%p3022_p9)
}
 0x19b   :  { %s3045_s29 = smov 128   ;;  %s3046_s30 = smov 8  }
 0x19c   :  { %2416 = dma.vmem_to_hbm [thread:$0]  %s2411_s3, 256, %s4213_s5, [#allocation5], %s3045_s29, %s3045_s29, %s3046_s30  }
 0x19d   :  { %3036 = dma.done.wait [#allocation5], 256  }
 0x19e   :  { %3037 = vsyncadd [#allocation5], 4294967040 }
 0x19f   :  { %2420 = vsyncpa [#allocation4], 1 }
 0x1a0   :  { %2421 = vsyncpa [#allocation5], 1 }

</bundles_post_ra>
